<compile_context>
chip_gen: v7x
topology: tpu7x:2x2x1
jax: 0.10.0
libtpu: 0.0.40
codegen_flags: <defaults>
</compile_context>

<pallas_src>
import functools
import math

import jax
import jax.numpy as jnp
from jax.experimental import pallas as pl
from jax.experimental.pallas import tpu as pltpu


# ----------------------------------------------------------------------------
# helpers
# ----------------------------------------------------------------------------
def _layernorm(x, g, b, eps):
    mu = jnp.mean(x, axis=-1, keepdims=True)
    var = jnp.mean((x - mu) ** 2, axis=-1, keepdims=True)
    return (x - mu) * jax.lax.rsqrt(var + eps) * g + b


# ----------------------------------------------------------------------------
# fused TransVG kernel: projections + [REG] concat + L encoder layers + bbox MLP
# grid = (B, L); activation carried in a VMEM scratch across the L axis
# ----------------------------------------------------------------------------
def _transvg_kernel(
        # per-batch inputs (grid axis 0)
        tmask_ref, vmask_ref, text_ref, visu_ref,
        # shared inputs
        reg_ref, pos_ref, wtp_ref, btp_ref, wvp_ref, bvp_ref,
        # stacked per-layer weights (grid axis 1)
        wqk_ref, bqk_ref, wva_ref, bva_ref, wo_ref, bo_ref,
        g1_ref, be1_ref, w1_ref, b1_ref, w2_ref, b2_ref, g2_ref, be2_ref,
        # bbox head (shared)
        hw1_ref, hb1_ref, hw2_ref, hb2_ref, hw3_ref, hb3_ref,
        # output
        box_ref,
        # scratch
        act_ref, bias_ref,
        *, num_heads, eps):
    l_idx = pl.program_id(1)
    n_layers = pl.num_programs(1)

    # --- layer 0 of each batch: fused visu/text projections, [REG] concat,
    #     and additive key-padding bias (replaces 2 pallas_calls + XLA ops) ---
    @pl.when(l_idx == 0)
    def _():
        t_emb = jnp.dot(text_ref[0].astype(jnp.bfloat16), wtp_ref[...],
                        preferred_element_type=jnp.float32) + btp_ref[...]
        v_emb = jnp.dot(visu_ref[0].astype(jnp.bfloat16), wvp_ref[...],
                        preferred_element_type=jnp.float32) + bvp_ref[...]
        # order matches PyTorch: [tgt(REG), text, visu]
        act_ref[...] = jnp.concatenate([reg_ref[...], t_emb, v_emb], axis=0)
        zero = jnp.zeros((1, 1), jnp.float32)
        bias_ref[...] = jnp.concatenate(
            [zero, tmask_ref[0], vmask_ref[0]], axis=1) * jnp.float32(-1e30)

    x = act_ref[...]                      # (S, D) f32, VMEM-resident carry
    pos = pos_ref[...]                    # (S, D) shared positional embedding
    bias = bias_ref[...]                  # (1, S) additive key-padding bias (f32)
    S, D = x.shape
    hd = D // num_heads
    scale = 1.0 / math.sqrt(hd)

    # --- multi-head self-attention (DETR-style: q = k = src + pos, v = src) --
    qk_in = (x + pos).astype(jnp.bfloat16)
    qk = jnp.dot(qk_in, wqk_ref[0], preferred_element_type=jnp.float32) + bqk_ref[0]
    v = jnp.dot(x.astype(jnp.bfloat16), wva_ref[0],
                preferred_element_type=jnp.float32) + bva_ref[0]
    qk_b = qk.astype(jnp.bfloat16)        # (S, 2D) lane-dense
    v_b = v.astype(jnp.bfloat16)          # (S, D)

    heads = []
    for h in range(num_heads):            # intrinsic per-head score/AV blocks
        qh = qk_b[:, h * hd:(h + 1) * hd]
        kh = qk_b[:, D + h * hd:D + (h + 1) * hd]
        vh = v_b[:, h * hd:(h + 1) * hd]
        s = jax.lax.dot_general(qh, kh, (((1,), (1,)), ((), ())),
                                preferred_element_type=jnp.float32)
        s = s * scale + bias              # f32 score math; bias stays f32
        m = jnp.max(s, axis=-1, keepdims=True)
        p = jnp.exp(s - m)
        denom = jnp.sum(p, axis=-1, keepdims=True)
        oh = jnp.dot(p.astype(jnp.bfloat16), vh,
                     preferred_element_type=jnp.float32)
        heads.append(oh / denom)          # exact normalization
    attn = jnp.concatenate(heads, axis=-1)                      # (S, D)
    attn = jnp.dot(attn.astype(jnp.bfloat16), wo_ref[0],
                   preferred_element_type=jnp.float32) + bo_ref[0]

    # --- residual + LN1, FFN(ReLU), residual + LN2 (all f32, all in VMEM) ----
    x1 = _layernorm(x + attn, g1_ref[0], be1_ref[0], eps)
    f = jnp.dot(x1.astype(jnp.bfloat16), w1_ref[0],
                preferred_element_type=jnp.float32) + b1_ref[0]
    f = jnp.maximum(f, 0.0)
    f = jnp.dot(f.astype(jnp.bfloat16), w2_ref[0],
                preferred_element_type=jnp.float32) + b2_ref[0]
    x2 = _layernorm(x1 + f, g2_ref[0], be2_ref[0], eps)
    act_ref[...] = x2                     # carry to next layer (no HBM trip)

    # --- after the last layer: fused bbox MLP head on the [REG] token --------
    @pl.when(l_idx == n_layers - 1)
    def _():
        r = x2[0:1, :].astype(jnp.bfloat16)                     # (1, D)
        h1 = jnp.maximum(jnp.dot(r, hw1_ref[...],
                                 preferred_element_type=jnp.float32) + hb1_ref[...], 0.0)
        h2 = jnp.maximum(jnp.dot(h1.astype(jnp.bfloat16), hw2_ref[...],
                                 preferred_element_type=jnp.float32) + hb2_ref[...], 0.0)
        y = jnp.dot(h2.astype(jnp.bfloat16), hw3_ref[...],
                    preferred_element_type=jnp.float32) + hb3_ref[...]
        box_ref[0] = jax.nn.sigmoid(y)                          # (1, 4)


# ----------------------------------------------------------------------------
# parameters
# ----------------------------------------------------------------------------
def _init_linear(key, fan_in, fan_out, w_dtype=jnp.bfloat16):
    kw, kb = jax.random.split(key)
    bound = 1.0 / math.sqrt(fan_in)
    w = jax.random.uniform(kw, (fan_in, fan_out), jnp.float32, -bound, bound)
    b = jax.random.uniform(kb, (fan_out,), jnp.float32, -bound, bound)
    return w.astype(w_dtype), b.reshape(1, fan_out)


def init_params(key, *, visu_ch, text_ch, hidden, num_total, num_layers,
                ffn_dim, num_heads):
    del num_heads  # head split is a static reshape of the fused QK/V matmuls
    keys = iter(jax.random.split(key, 16 + 8 * num_layers))
    p = {}
    p["vl_pos_embed"] = 0.02 * jax.random.normal(next(keys), (num_total, hidden), jnp.float32)
    p["reg_token"] = 0.02 * jax.random.normal(next(keys), (1, hidden), jnp.float32)
    p["visu_proj_w"], p["visu_proj_b"] = _init_linear(next(keys), visu_ch, hidden)
    p["text_proj_w"], p["text_proj_b"] = _init_linear(next(keys), text_ch, hidden)

    layer_list = []
    for _ in range(num_layers):
        wq, bq = _init_linear(next(keys), hidden, hidden)
        wk, bk = _init_linear(next(keys), hidden, hidden)
        wv, bv = _init_linear(next(keys), hidden, hidden)
        wo, bo = _init_linear(next(keys), hidden, hidden)
        w1, b1 = _init_linear(next(keys), hidden, ffn_dim)
        w2, b2 = _init_linear(next(keys), ffn_dim, hidden)
        layer_list.append(dict(
            wqk=jnp.concatenate([wq, wk], axis=1),   # (D, 2D) bf16, lane-dense QK proj
            bqk=jnp.concatenate([bq, bk], axis=1),   # (1, 2D) f32
            wv=wv, bv=bv, wo=wo, bo=bo,
            w1=w1, b1=b1, w2=w2, b2=b2,
            ln1_g=jnp.ones((1, hidden), jnp.float32),
            ln1_b=jnp.zeros((1, hidden), jnp.float32),
            ln2_g=jnp.ones((1, hidden), jnp.float32),
            ln2_b=jnp.zeros((1, hidden), jnp.float32)))
    # stack per-layer weights with a leading (L,) axis -> indexed by the layer grid axis
    p["enc"] = {k: jnp.stack([lp[k] for lp in layer_list], axis=0)
                for k in layer_list[0]}

    p["bbox_w1"], p["bbox_b1"] = _init_linear(next(keys), hidden, hidden)
    p["bbox_w2"], p["bbox_b2"] = _init_linear(next(keys), hidden, hidden)
    p["bbox_w3"], p["bbox_b3"] = _init_linear(next(keys), hidden, 4)
    return p


# ----------------------------------------------------------------------------
# TransVG forward
# ----------------------------------------------------------------------------
def transvg_forward(params, visu_src, visu_mask, text_src, text_mask, num_heads=4):
    """
    visu_src : (num_visu_token, bs, visu_channels)  -- DETR output features
    visu_mask: (bs, num_visu_token) bool, True = padded
    text_src : (bs, num_text_token, text_channels)  -- BERT output features
    text_mask: (bs, num_text_token) bool, True = padded
    returns  : (bs, 4) sigmoid box predictions
    """
    Nv, B, Cv = visu_src.shape
    _, Nt, Ct = text_src.shape
    D = params["reg_token"].shape[1]
    S = 1 + Nt + Nv
    enc = params["enc"]
    L = enc["wqk"].shape[0]
    F = enc["w1"].shape[2]
    H = num_heads

    # tiny host-side layout fixes; everything else happens inside the kernel
    visu_bm = jnp.transpose(visu_src, (1, 0, 2))                  # (B, Nv, Cv)
    tmask = text_mask.astype(jnp.float32).reshape(B, 1, Nt)       # 1.0 = padded
    vmask = visu_mask.astype(jnp.float32).reshape(B, 1, Nv)

    def _shared(x):
        nd = x.ndim
        return pl.BlockSpec(x.shape, lambda b, l, nd=nd: (0,) * nd)

    def _batched(x):   # leading dim indexed by batch grid axis
        nd = x.ndim
        return pl.BlockSpec((1,) + x.shape[1:],
                            lambda b, l, nd=nd: (b,) + (0,) * (nd - 1))

    def _layered(x):   # leading dim indexed by layer grid axis
        nd = x.ndim
        return pl.BlockSpec((1,) + x.shape[1:],
                            lambda b, l, nd=nd: (l,) + (0,) * (nd - 1))

    flops_layer = 2 * S * D * (2 * D) + 2 * S * D * D + 4 * S * S * D \
        + 2 * S * D * D + 4 * S * D * F
    flops = B * (L * flops_layer + 2 * Nt * Ct * D + 2 * Nv * Cv * D
                 + 2 * D * (2 * D + 4))
    cost = pl.CostEstimate(
        flops=int(flops),
        transcendentals=int(B * (L * H * S * S + 4)),
        bytes_accessed=int(4 * B * (Nt * Ct + Nv * Cv + S + 4)
                           + 2 * L * (2 * D * D + 2 * D * D + 2 * D * F)
                           + 4 * L * (2 * D + D + D + F + D + 4 * D)))

    out = pl.pallas_call(
        functools.partial(_transvg_kernel, num_heads=H, eps=1e-5),
        out_shape=jax.ShapeDtypeStruct((B, 1, 4), jnp.float32),
        grid=(B, L),
        in_specs=[
            _batched(tmask), _batched(vmask), _batched(text_src), _batched(visu_bm),
            _shared(params["reg_token"]), _shared(params["vl_pos_embed"]),
            _shared(params["text_proj_w"]), _shared(params["text_proj_b"]),
            _shared(params["visu_proj_w"]), _shared(params["visu_proj_b"]),
            _layered(enc["wqk"]), _layered(enc["bqk"]),
            _layered(enc["wv"]), _layered(enc["bv"]),
            _layered(enc["wo"]), _layered(enc["bo"]),
            _layered(enc["ln1_g"]), _layered(enc["ln1_b"]),
            _layered(enc["w1"]), _layered(enc["b1"]),
            _layered(enc["w2"]), _layered(enc["b2"]),
            _layered(enc["ln2_g"]), _layered(enc["ln2_b"]),
            _shared(params["bbox_w1"]), _shared(params["bbox_b1"]),
            _shared(params["bbox_w2"]), _shared(params["bbox_b2"]),
            _shared(params["bbox_w3"]), _shared(params["bbox_b3"]),
        ],
        out_specs=pl.BlockSpec((1, 1, 4), lambda b, l: (b, 0, 0)),
        scratch_shapes=[pltpu.VMEM((S, D), jnp.float32),     # activation carry
                        pltpu.VMEM((1, S), jnp.float32)],    # key-padding bias
        compiler_params=pltpu.CompilerParams(
            dimension_semantics=("parallel", "arbitrary")),
        cost_estimate=cost,
    )(tmask, vmask, text_src, visu_bm,
      params["reg_token"], params["vl_pos_embed"],
      params["text_proj_w"], params["text_proj_b"],
      params["visu_proj_w"], params["visu_proj_b"],
      enc["wqk"], enc["bqk"], enc["wv"], enc["bv"], enc["wo"], enc["bo"],
      enc["ln1_g"], enc["ln1_b"], enc["w1"], enc["b1"], enc["w2"], enc["b2"],
      enc["ln2_g"], enc["ln2_b"],
      params["bbox_w1"], params["bbox_b1"],
      params["bbox_w2"], params["bbox_b2"],
      params["bbox_w3"], params["bbox_b3"])
    return out.reshape(B, 4)


# ----------------------------------------------------------------------------
# Demo
# ----------------------------------------------------------------------------
if __name__ == "__main__":
    # small synthetic config consistent with the module:
    #   imsize=128, dilation=False -> divisor=32 -> num_visu_token = (128/32)**2 = 16
    #   max_query_len = 8, vl_hidden_dim = 32
    bs = 2
    hidden = 32
    num_visu_token = 16
    num_text_token = 8
    visu_ch = 64        # stand-in for DETR num_channels
    text_ch = 48        # stand-in for BERT num_channels
    num_total = num_visu_token + num_text_token + 1
    num_layers = 2
    num_heads = 4
    ffn_dim = 64

    root = jax.random.PRNGKey(0)
    k_par, k_vis, k_txt = jax.random.split(root, 3)
    params = init_params(
        k_par, visu_ch=visu_ch, text_ch=text_ch, hidden=hidden,
        num_total=num_total, num_layers=num_layers, ffn_dim=ffn_dim,
        num_heads=num_heads)

    visu_src = jax.random.normal(k_vis, (num_visu_token, bs, visu_ch), jnp.float32)
    text_src = jax.random.normal(k_txt, (bs, num_text_token, text_ch), jnp.float32)
    visu_mask = jnp.zeros((bs, num_visu_token), dtype=bool).at[1, 12:].set(True)
    text_mask = jnp.zeros((bs, num_text_token), dtype=bool).at[0, 6:].set(True).at[1, 5:].set(True)

    fwd = jax.jit(functools.partial(transvg_forward, num_heads=num_heads))
    pred_box = jax.block_until_ready(
        fwd(params, visu_src, visu_mask, text_src, text_mask))

    assert pred_box.shape == (bs, 4)
    assert bool(jnp.all(jnp.isfinite(pred_box)))
    assert bool(jnp.all((pred_box >= 0.0) & (pred_box <= 1.0)))
    print("KERNEL_OK")
</pallas_src>

<mosaic_0001>
module attributes {stable_mosaic.version = 11 : i64} {
  func.func @_transvg_kernel(%arg0: i32, %arg1: i32, %arg2: memref<1x1x8xf32, #tpu.memory_space<vmem>>, %arg3: memref<1x1x16xf32, #tpu.memory_space<vmem>>, %arg4: memref<1x8x48xf32, #tpu.memory_space<vmem>>, %arg5: memref<1x16x64xf32, #tpu.memory_space<vmem>>, %arg6: memref<1x32xf32, #tpu.memory_space<vmem>>, %arg7: memref<25x32xf32, #tpu.memory_space<vmem>>, %arg8: memref<48x32xbf16, #tpu.memory_space<vmem>>, %arg9: memref<1x32xf32, #tpu.memory_space<vmem>>, %arg10: memref<64x32xbf16, #tpu.memory_space<vmem>>, %arg11: memref<1x32xf32, #tpu.memory_space<vmem>>, %arg12: memref<1x32x64xbf16, #tpu.memory_space<vmem>>, %arg13: memref<1x1x64xf32, #tpu.memory_space<vmem>>, %arg14: memref<1x32x32xbf16, #tpu.memory_space<vmem>>, %arg15: memref<1x1x32xf32, #tpu.memory_space<vmem>>, %arg16: memref<1x32x32xbf16, #tpu.memory_space<vmem>>, %arg17: memref<1x1x32xf32, #tpu.memory_space<vmem>>, %arg18: memref<1x1x32xf32, #tpu.memory_space<vmem>>, %arg19: memref<1x1x32xf32, #tpu.memory_space<vmem>>, %arg20: memref<1x32x64xbf16, #tpu.memory_space<vmem>>, %arg21: memref<1x1x64xf32, #tpu.memory_space<vmem>>, %arg22: memref<1x64x32xbf16, #tpu.memory_space<vmem>>, %arg23: memref<1x1x32xf32, #tpu.memory_space<vmem>>, %arg24: memref<1x1x32xf32, #tpu.memory_space<vmem>>, %arg25: memref<1x1x32xf32, #tpu.memory_space<vmem>>, %arg26: memref<32x32xbf16, #tpu.memory_space<vmem>>, %arg27: memref<1x32xf32, #tpu.memory_space<vmem>>, %arg28: memref<32x32xbf16, #tpu.memory_space<vmem>>, %arg29: memref<1x32xf32, #tpu.memory_space<vmem>>, %arg30: memref<32x4xbf16, #tpu.memory_space<vmem>>, %arg31: memref<1x4xf32, #tpu.memory_space<vmem>>, %arg32: memref<1x1x4xf32, #tpu.memory_space<vmem>>, %arg33: memref<25x32xf32, #tpu.memory_space<vmem>>, %arg34: memref<1x25xf32, #tpu.memory_space<vmem>>) attributes {dimension_semantics = [#tpu.dimension_semantics<parallel>, #tpu.dimension_semantics<arbitrary>], iteration_bounds = array<i64: 2, 2>, scalar_prefetch = 0 : i64, scratch_operands = 2 : i64, tpu.core_type = #tpu.core_type<tc>, window_params = [{transform_indices = @transform_0, window_bounds = array<i64: 1, 1, 8>}, {transform_indices = @transform_1, window_bounds = array<i64: 1, 1, 16>}, {transform_indices = @transform_2, window_bounds = array<i64: 1, 8, 48>}, {transform_indices = @transform_3, window_bounds = array<i64: 1, 16, 64>}, {pipeline_mode = #tpu.pipeline_mode<synchronous>, transform_indices = @transform_4, window_bounds = array<i64: 1, 32>}, {pipeline_mode = #tpu.pipeline_mode<synchronous>, transform_indices = @transform_5, window_bounds = array<i64: 25, 32>}, {pipeline_mode = #tpu.pipeline_mode<synchronous>, transform_indices = @transform_6, window_bounds = array<i64: 48, 32>}, {pipeline_mode = #tpu.pipeline_mode<synchronous>, transform_indices = @transform_7, window_bounds = array<i64: 1, 32>}, {pipeline_mode = #tpu.pipeline_mode<synchronous>, transform_indices = @transform_8, window_bounds = array<i64: 64, 32>}, {pipeline_mode = #tpu.pipeline_mode<synchronous>, transform_indices = @transform_9, window_bounds = array<i64: 1, 32>}, {transform_indices = @transform_10, window_bounds = array<i64: 1, 32, 64>}, {transform_indices = @transform_11, window_bounds = array<i64: 1, 1, 64>}, {transform_indices = @transform_12, window_bounds = array<i64: 1, 32, 32>}, {transform_indices = @transform_13, window_bounds = array<i64: 1, 1, 32>}, {transform_indices = @transform_14, window_bounds = array<i64: 1, 32, 32>}, {transform_indices = @transform_15, window_bounds = array<i64: 1, 1, 32>}, {transform_indices = @transform_16, window_bounds = array<i64: 1, 1, 32>}, {transform_indices = @transform_17, window_bounds = array<i64: 1, 1, 32>}, {transform_indices = @transform_18, window_bounds = array<i64: 1, 32, 64>}, {transform_indices = @transform_19, window_bounds = array<i64: 1, 1, 64>}, {transform_indices = @transform_20, window_bounds = array<i64: 1, 64, 32>}, {transform_indices = @transform_21, window_bounds = array<i64: 1, 1, 32>}, {transform_indices = @transform_22, window_bounds = array<i64: 1, 1, 32>}, {transform_indices = @transform_23, window_bounds = array<i64: 1, 1, 32>}, {pipeline_mode = #tpu.pipeline_mode<synchronous>, transform_indices = @transform_24, window_bounds = array<i64: 32, 32>}, {pipeline_mode = #tpu.pipeline_mode<synchronous>, transform_indices = @transform_25, window_bounds = array<i64: 1, 32>}, {pipeline_mode = #tpu.pipeline_mode<synchronous>, transform_indices = @transform_26, window_bounds = array<i64: 32, 32>}, {pipeline_mode = #tpu.pipeline_mode<synchronous>, transform_indices = @transform_27, window_bounds = array<i64: 1, 32>}, {pipeline_mode = #tpu.pipeline_mode<synchronous>, transform_indices = @transform_28, window_bounds = array<i64: 32, 4>}, {pipeline_mode = #tpu.pipeline_mode<synchronous>, transform_indices = @transform_29, window_bounds = array<i64: 1, 4>}, {transform_indices = @transform_30, window_bounds = array<i64: 1, 1, 4>}]} {
    %c0_i32 = arith.constant 0 : i32
    %0 = arith.cmpi eq, %arg1, %c0_i32 : i32
    %1 = arith.extui %0 : i1 to i32
    %c0_i32_0 = arith.constant 0 : i32
    %2 = arith.cmpi ne, %1, %c0_i32_0 : i32
    scf.if %2 {
      %c0_86 = arith.constant 0 : index
      %c0_87 = arith.constant 0 : index
      %c0_88 = arith.constant 0 : index
      %186 = vector.load %arg4[%c0_86, %c0_87, %c0_88] : memref<1x8x48xf32, #tpu.memory_space<vmem>>, vector<1x8x48xf32>
      %187 = vector.shape_cast %186 : vector<1x8x48xf32> to vector<8x48xf32>
      %188 = arith.truncf %187 : vector<8x48xf32> to vector<8x48xbf16>
      %c0_89 = arith.constant 0 : index
      %c0_90 = arith.constant 0 : index
      %189 = vector.load %arg8[%c0_89, %c0_90] : memref<48x32xbf16, #tpu.memory_space<vmem>>, vector<48x32xbf16>
      %cst_91 = arith.constant dense<0.000000e+00> : vector<8x32xf32>
      %190 = tpu.matmul %188, %189, %cst_91 {dimension_numbers = #tpu.dot_dimension_numbers<[1], [0], [0], [1], [0, 0, 1, 1], [], []>} : vector<8x48xbf16>, vector<48x32xbf16>, vector<8x32xf32> -> vector<8x32xf32>
      %c0_92 = arith.constant 0 : index
      %c0_93 = arith.constant 0 : index
      %191 = vector.load %arg9[%c0_92, %c0_93] : memref<1x32xf32, #tpu.memory_space<vmem>>, vector<1x32xf32>
      %192 = vector.broadcast %191 : vector<1x32xf32> to vector<8x32xf32>
      %193 = arith.addf %190, %192 : vector<8x32xf32>
      %c0_94 = arith.constant 0 : index
      %c0_95 = arith.constant 0 : index
      %c0_96 = arith.constant 0 : index
      %194 = vector.load %arg5[%c0_94, %c0_95, %c0_96] : memref<1x16x64xf32, #tpu.memory_space<vmem>>, vector<1x16x64xf32>
      %195 = vector.shape_cast %194 : vector<1x16x64xf32> to vector<16x64xf32>
      %196 = arith.truncf %195 : vector<16x64xf32> to vector<16x64xbf16>
      %c0_97 = arith.constant 0 : index
      %c0_98 = arith.constant 0 : index
      %197 = vector.load %arg10[%c0_97, %c0_98] : memref<64x32xbf16, #tpu.memory_space<vmem>>, vector<64x32xbf16>
      %cst_99 = arith.constant dense<0.000000e+00> : vector<16x32xf32>
      %198 = tpu.matmul %196, %197, %cst_99 {dimension_numbers = #tpu.dot_dimension_numbers<[1], [0], [0], [1], [0, 0, 1, 1], [], []>} : vector<16x64xbf16>, vector<64x32xbf16>, vector<16x32xf32> -> vector<16x32xf32>
      %c0_100 = arith.constant 0 : index
      %c0_101 = arith.constant 0 : index
      %199 = vector.load %arg11[%c0_100, %c0_101] : memref<1x32xf32, #tpu.memory_space<vmem>>, vector<1x32xf32>
      %200 = vector.broadcast %199 : vector<1x32xf32> to vector<16x32xf32>
      %201 = arith.addf %198, %200 : vector<16x32xf32>
      %c0_102 = arith.constant 0 : index
      %c0_103 = arith.constant 0 : index
      %202 = vector.load %arg6[%c0_102, %c0_103] : memref<1x32xf32, #tpu.memory_space<vmem>>, vector<1x32xf32>
      %203 = tpu.concatenate %202, %193, %201 in 0 : vector<1x32xf32>, vector<8x32xf32>, vector<16x32xf32> -> vector<25x32xf32>
      %c0_104 = arith.constant 0 : index
      %c0_105 = arith.constant 0 : index
      %204 = vector.load %arg33[%c0_104, %c0_105] : memref<25x32xf32, #tpu.memory_space<vmem>>, vector<25x32xf32>
      tpu.vector_store %arg33[%c0_104, %c0_105], %203 {strides = array<i32>} : memref<25x32xf32, #tpu.memory_space<vmem>>, vector<25x32xf32>,
      %cst_106 = arith.constant 0.000000e+00 : f32
      %205 = vector.broadcast %cst_106 : f32 to vector<1x1xf32>
      %c0_107 = arith.constant 0 : index
      %c0_108 = arith.constant 0 : index
      %c0_109 = arith.constant 0 : index
      %206 = vector.load %arg2[%c0_107, %c0_108, %c0_109] : memref<1x1x8xf32, #tpu.memory_space<vmem>>, vector<1x1x8xf32>
      %207 = vector.shape_cast %206 : vector<1x1x8xf32> to vector<1x8xf32>
      %c0_110 = arith.constant 0 : index
      %c0_111 = arith.constant 0 : index
      %c0_112 = arith.constant 0 : index
      %208 = vector.load %arg3[%c0_110, %c0_111, %c0_112] : memref<1x1x16xf32, #tpu.memory_space<vmem>>, vector<1x1x16xf32>
      %209 = vector.shape_cast %208 : vector<1x1x16xf32> to vector<1x16xf32>
      %210 = tpu.concatenate %205, %207, %209 in 1 : vector<1x1xf32>, vector<1x8xf32>, vector<1x16xf32> -> vector<1x25xf32>
      %cst_113 = arith.constant -1.000000e+30 : f32
      %211 = vector.broadcast %cst_113 : f32 to vector<1x25xf32>
      %212 = arith.mulf %210, %211 : vector<1x25xf32>
      %c0_114 = arith.constant 0 : index
      %c0_115 = arith.constant 0 : index
      %213 = vector.load %arg34[%c0_114, %c0_115] : memref<1x25xf32, #tpu.memory_space<vmem>>, vector<1x25xf32>
      tpu.vector_store %arg34[%c0_114, %c0_115], %212 {strides = array<i32>} : memref<1x25xf32, #tpu.memory_space<vmem>>, vector<1x25xf32>,
    } else {
    }
    %c0 = arith.constant 0 : index
    %c0_1 = arith.constant 0 : index
    %3 = vector.load %arg33[%c0, %c0_1] : memref<25x32xf32, #tpu.memory_space<vmem>>, vector<25x32xf32>
    %c0_2 = arith.constant 0 : index
    %c0_3 = arith.constant 0 : index
    %4 = vector.load %arg7[%c0_2, %c0_3] : memref<25x32xf32, #tpu.memory_space<vmem>>, vector<25x32xf32>
    %c0_4 = arith.constant 0 : index
    %c0_5 = arith.constant 0 : index
    %5 = vector.load %arg34[%c0_4, %c0_5] : memref<1x25xf32, #tpu.memory_space<vmem>>, vector<1x25xf32>
    %6 = arith.addf %3, %4 : vector<25x32xf32>
    %7 = arith.truncf %6 : vector<25x32xf32> to vector<25x32xbf16>
    %c0_6 = arith.constant 0 : index
    %c0_7 = arith.constant 0 : index
    %c0_8 = arith.constant 0 : index
    %8 = vector.load %arg12[%c0_6, %c0_7, %c0_8] : memref<1x32x64xbf16, #tpu.memory_space<vmem>>, vector<1x32x64xbf16>
    %9 = vector.shape_cast %8 : vector<1x32x64xbf16> to vector<32x64xbf16>
    %cst = arith.constant dense<0.000000e+00> : vector<25x64xf32>
    %10 = tpu.matmul %7, %9, %cst {dimension_numbers = #tpu.dot_dimension_numbers<[1], [0], [0], [1], [0, 0, 1, 1], [], []>} : vector<25x32xbf16>, vector<32x64xbf16>, vector<25x64xf32> -> vector<25x64xf32>
    %c0_9 = arith.constant 0 : index
    %c0_10 = arith.constant 0 : index
    %c0_11 = arith.constant 0 : index
    %11 = vector.load %arg13[%c0_9, %c0_10, %c0_11] : memref<1x1x64xf32, #tpu.memory_space<vmem>>, vector<1x1x64xf32>
    %12 = vector.shape_cast %11 : vector<1x1x64xf32> to vector<1x64xf32>
    %13 = vector.broadcast %12 : vector<1x64xf32> to vector<25x64xf32>
    %14 = arith.addf %10, %13 : vector<25x64xf32>
    %15 = arith.truncf %3 : vector<25x32xf32> to vector<25x32xbf16>
    %c0_12 = arith.constant 0 : index
    %c0_13 = arith.constant 0 : index
    %c0_14 = arith.constant 0 : index
    %16 = vector.load %arg14[%c0_12, %c0_13, %c0_14] : memref<1x32x32xbf16, #tpu.memory_space<vmem>>, vector<1x32x32xbf16>
    %17 = vector.shape_cast %16 : vector<1x32x32xbf16> to vector<32x32xbf16>
    %cst_15 = arith.constant dense<0.000000e+00> : vector<25x32xf32>
    %18 = tpu.matmul %15, %17, %cst_15 {dimension_numbers = #tpu.dot_dimension_numbers<[1], [0], [0], [1], [0, 0, 1, 1], [], []>} : vector<25x32xbf16>, vector<32x32xbf16>, vector<25x32xf32> -> vector<25x32xf32>
    %c0_16 = arith.constant 0 : index
    %c0_17 = arith.constant 0 : index
    %c0_18 = arith.constant 0 : index
    %19 = vector.load %arg15[%c0_16, %c0_17, %c0_18] : memref<1x1x32xf32, #tpu.memory_space<vmem>>, vector<1x1x32xf32>
    %20 = vector.shape_cast %19 : vector<1x1x32xf32> to vector<1x32xf32>
    %21 = vector.broadcast %20 : vector<1x32xf32> to vector<25x32xf32>
    %22 = arith.addf %18, %21 : vector<25x32xf32>
    %23 = arith.truncf %14 : vector<25x64xf32> to vector<25x64xbf16>
    %24 = arith.truncf %22 : vector<25x32xf32> to vector<25x32xbf16>
    %25 = vector.extract_strided_slice %23 {offsets = [0, 0], sizes = [25, 8], strides = [1, 1]} : vector<25x64xbf16> to vector<25x8xbf16>
    %26 = vector.extract_strided_slice %23 {offsets = [0, 32], sizes = [25, 8], strides = [1, 1]} : vector<25x64xbf16> to vector<25x8xbf16>
    %27 = vector.extract_strided_slice %24 {offsets = [0, 0], sizes = [25, 8], strides = [1, 1]} : vector<25x32xbf16> to vector<25x8xbf16>
    %cst_19 = arith.constant dense<0.000000e+00> : vector<25x25xf32>
    %28 = tpu.matmul %25, %26, %cst_19 {dimension_numbers = #tpu.dot_dimension_numbers<[1], [1], [0], [0], [0, 0, 1, 0], [], []>} : vector<25x8xbf16>, vector<25x8xbf16>, vector<25x25xf32> -> vector<25x25xf32>
    %cst_20 = arith.constant 0.353553385 : f32
    %29 = vector.broadcast %cst_20 : f32 to vector<25x25xf32>
    %30 = arith.mulf %28, %29 : vector<25x25xf32>
    %31 = vector.broadcast %5 : vector<1x25xf32> to vector<25x25xf32>
    %32 = arith.addf %30, %31 : vector<25x25xf32>
    %cst_21 = arith.constant dense<0xFF800000> : vector<25xf32>
    %33 = vector.multi_reduction <maximumf>, %32, %cst_21 [1] : vector<25x25xf32> to vector<25xf32>
    %34 = vector.shape_cast %33 : vector<25xf32> to vector<25x1xf32>
    %35 = vector.broadcast %34 : vector<25x1xf32> to vector<25x25xf32>
    %36 = arith.subf %32, %35 : vector<25x25xf32>
    %37 = math.exp %36 : vector<25x25xf32>
    %cst_22 = arith.constant dense<0.000000e+00> : vector<25xf32>
    %38 = vector.multi_reduction <add>, %37, %cst_22 [1] : vector<25x25xf32> to vector<25xf32>
    %39 = vector.shape_cast %38 : vector<25xf32> to vector<25x1xf32>
    %40 = arith.truncf %37 : vector<25x25xf32> to vector<25x25xbf16>
    %cst_23 = arith.constant dense<0.000000e+00> : vector<25x8xf32>
    %41 = tpu.matmul %40, %27, %cst_23 {dimension_numbers = #tpu.dot_dimension_numbers<[1], [0], [0], [1], [0, 0, 1, 1], [], []>} : vector<25x25xbf16>, vector<25x8xbf16>, vector<25x8xf32> -> vector<25x8xf32>
    %42 = vector.broadcast %39 : vector<25x1xf32> to vector<25x8xf32>
    %43 = arith.divf %41, %42 : vector<25x8xf32>
    %44 = vector.extract_strided_slice %23 {offsets = [0, 8], sizes = [25, 8], strides = [1, 1]} : vector<25x64xbf16> to vector<25x8xbf16>
    %45 = vector.extract_strided_slice %23 {offsets = [0, 40], sizes = [25, 8], strides = [1, 1]} : vector<25x64xbf16> to vector<25x8xbf16>
    %46 = vector.extract_strided_slice %24 {offsets = [0, 8], sizes = [25, 8], strides = [1, 1]} : vector<25x32xbf16> to vector<25x8xbf16>
    %cst_24 = arith.constant dense<0.000000e+00> : vector<25x25xf32>
    %47 = tpu.matmul %44, %45, %cst_24 {dimension_numbers = #tpu.dot_dimension_numbers<[1], [1], [0], [0], [0, 0, 1, 0], [], []>} : vector<25x8xbf16>, vector<25x8xbf16>, vector<25x25xf32> -> vector<25x25xf32>
    %cst_25 = arith.constant 0.353553385 : f32
    %48 = vector.broadcast %cst_25 : f32 to vector<25x25xf32>
    %49 = arith.mulf %47, %48 : vector<25x25xf32>
    %50 = vector.broadcast %5 : vector<1x25xf32> to vector<25x25xf32>
    %51 = arith.addf %49, %50 : vector<25x25xf32>
    %cst_26 = arith.constant dense<0xFF800000> : vector<25xf32>
    %52 = vector.multi_reduction <maximumf>, %51, %cst_26 [1] : vector<25x25xf32> to vector<25xf32>
    %53 = vector.shape_cast %52 : vector<25xf32> to vector<25x1xf32>
    %54 = vector.broadcast %53 : vector<25x1xf32> to vector<25x25xf32>
    %55 = arith.subf %51, %54 : vector<25x25xf32>
    %56 = math.exp %55 : vector<25x25xf32>
    %cst_27 = arith.constant dense<0.000000e+00> : vector<25xf32>
    %57 = vector.multi_reduction <add>, %56, %cst_27 [1] : vector<25x25xf32> to vector<25xf32>
    %58 = vector.shape_cast %57 : vector<25xf32> to vector<25x1xf32>
    %59 = arith.truncf %56 : vector<25x25xf32> to vector<25x25xbf16>
    %cst_28 = arith.constant dense<0.000000e+00> : vector<25x8xf32>
    %60 = tpu.matmul %59, %46, %cst_28 {dimension_numbers = #tpu.dot_dimension_numbers<[1], [0], [0], [1], [0, 0, 1, 1], [], []>} : vector<25x25xbf16>, vector<25x8xbf16>, vector<25x8xf32> -> vector<25x8xf32>
    %61 = vector.broadcast %58 : vector<25x1xf32> to vector<25x8xf32>
    %62 = arith.divf %60, %61 : vector<25x8xf32>
    %63 = vector.extract_strided_slice %23 {offsets = [0, 16], sizes = [25, 8], strides = [1, 1]} : vector<25x64xbf16> to vector<25x8xbf16>
    %64 = vector.extract_strided_slice %23 {offsets = [0, 48], sizes = [25, 8], strides = [1, 1]} : vector<25x64xbf16> to vector<25x8xbf16>
    %65 = vector.extract_strided_slice %24 {offsets = [0, 16], sizes = [25, 8], strides = [1, 1]} : vector<25x32xbf16> to vector<25x8xbf16>
    %cst_29 = arith.constant dense<0.000000e+00> : vector<25x25xf32>
    %66 = tpu.matmul %63, %64, %cst_29 {dimension_numbers = #tpu.dot_dimension_numbers<[1], [1], [0], [0], [0, 0, 1, 0], [], []>} : vector<25x8xbf16>, vector<25x8xbf16>, vector<25x25xf32> -> vector<25x25xf32>
    %cst_30 = arith.constant 0.353553385 : f32
    %67 = vector.broadcast %cst_30 : f32 to vector<25x25xf32>
    %68 = arith.mulf %66, %67 : vector<25x25xf32>
    %69 = vector.broadcast %5 : vector<1x25xf32> to vector<25x25xf32>
    %70 = arith.addf %68, %69 : vector<25x25xf32>
    %cst_31 = arith.constant dense<0xFF800000> : vector<25xf32>
    %71 = vector.multi_reduction <maximumf>, %70, %cst_31 [1] : vector<25x25xf32> to vector<25xf32>
    %72 = vector.shape_cast %71 : vector<25xf32> to vector<25x1xf32>
    %73 = vector.broadcast %72 : vector<25x1xf32> to vector<25x25xf32>
    %74 = arith.subf %70, %73 : vector<25x25xf32>
    %75 = math.exp %74 : vector<25x25xf32>
    %cst_32 = arith.constant dense<0.000000e+00> : vector<25xf32>
    %76 = vector.multi_reduction <add>, %75, %cst_32 [1] : vector<25x25xf32> to vector<25xf32>
    %77 = vector.shape_cast %76 : vector<25xf32> to vector<25x1xf32>
    %78 = arith.truncf %75 : vector<25x25xf32> to vector<25x25xbf16>
    %cst_33 = arith.constant dense<0.000000e+00> : vector<25x8xf32>
    %79 = tpu.matmul %78, %65, %cst_33 {dimension_numbers = #tpu.dot_dimension_numbers<[1], [0], [0], [1], [0, 0, 1, 1], [], []>} : vector<25x25xbf16>, vector<25x8xbf16>, vector<25x8xf32> -> vector<25x8xf32>
    %80 = vector.broadcast %77 : vector<25x1xf32> to vector<25x8xf32>
    %81 = arith.divf %79, %80 : vector<25x8xf32>
    %82 = vector.extract_strided_slice %23 {offsets = [0, 24], sizes = [25, 8], strides = [1, 1]} : vector<25x64xbf16> to vector<25x8xbf16>
    %83 = vector.extract_strided_slice %23 {offsets = [0, 56], sizes = [25, 8], strides = [1, 1]} : vector<25x64xbf16> to vector<25x8xbf16>
    %84 = vector.extract_strided_slice %24 {offsets = [0, 24], sizes = [25, 8], strides = [1, 1]} : vector<25x32xbf16> to vector<25x8xbf16>
    %cst_34 = arith.constant dense<0.000000e+00> : vector<25x25xf32>
    %85 = tpu.matmul %82, %83, %cst_34 {dimension_numbers = #tpu.dot_dimension_numbers<[1], [1], [0], [0], [0, 0, 1, 0], [], []>} : vector<25x8xbf16>, vector<25x8xbf16>, vector<25x25xf32> -> vector<25x25xf32>
    %cst_35 = arith.constant 0.353553385 : f32
    %86 = vector.broadcast %cst_35 : f32 to vector<25x25xf32>
    %87 = arith.mulf %85, %86 : vector<25x25xf32>
    %88 = vector.broadcast %5 : vector<1x25xf32> to vector<25x25xf32>
    %89 = arith.addf %87, %88 : vector<25x25xf32>
    %cst_36 = arith.constant dense<0xFF800000> : vector<25xf32>
    %90 = vector.multi_reduction <maximumf>, %89, %cst_36 [1] : vector<25x25xf32> to vector<25xf32>
    %91 = vector.shape_cast %90 : vector<25xf32> to vector<25x1xf32>
    %92 = vector.broadcast %91 : vector<25x1xf32> to vector<25x25xf32>
    %93 = arith.subf %89, %92 : vector<25x25xf32>
    %94 = math.exp %93 : vector<25x25xf32>
    %cst_37 = arith.constant dense<0.000000e+00> : vector<25xf32>
    %95 = vector.multi_reduction <add>, %94, %cst_37 [1] : vector<25x25xf32> to vector<25xf32>
    %96 = vector.shape_cast %95 : vector<25xf32> to vector<25x1xf32>
    %97 = arith.truncf %94 : vector<25x25xf32> to vector<25x25xbf16>
    %cst_38 = arith.constant dense<0.000000e+00> : vector<25x8xf32>
    %98 = tpu.matmul %97, %84, %cst_38 {dimension_numbers = #tpu.dot_dimension_numbers<[1], [0], [0], [1], [0, 0, 1, 1], [], []>} : vector<25x25xbf16>, vector<25x8xbf16>, vector<25x8xf32> -> vector<25x8xf32>
    %99 = vector.broadcast %96 : vector<25x1xf32> to vector<25x8xf32>
    %100 = arith.divf %98, %99 : vector<25x8xf32>
    %101 = tpu.concatenate %43, %62, %81, %100 in 1 : vector<25x8xf32>, vector<25x8xf32>, vector<25x8xf32>, vector<25x8xf32> -> vector<25x32xf32>
    %102 = arith.truncf %101 : vector<25x32xf32> to vector<25x32xbf16>
    %c0_39 = arith.constant 0 : index
    %c0_40 = arith.constant 0 : index
    %c0_41 = arith.constant 0 : index
    %103 = vector.load %arg16[%c0_39, %c0_40, %c0_41] : memref<1x32x32xbf16, #tpu.memory_space<vmem>>, vector<1x32x32xbf16>
    %104 = vector.shape_cast %103 : vector<1x32x32xbf16> to vector<32x32xbf16>
    %cst_42 = arith.constant dense<0.000000e+00> : vector<25x32xf32>
    %105 = tpu.matmul %102, %104, %cst_42 {dimension_numbers = #tpu.dot_dimension_numbers<[1], [0], [0], [1], [0, 0, 1, 1], [], []>} : vector<25x32xbf16>, vector<32x32xbf16>, vector<25x32xf32> -> vector<25x32xf32>
    %c0_43 = arith.constant 0 : index
    %c0_44 = arith.constant 0 : index
    %c0_45 = arith.constant 0 : index
    %106 = vector.load %arg17[%c0_43, %c0_44, %c0_45] : memref<1x1x32xf32, #tpu.memory_space<vmem>>, vector<1x1x32xf32>
    %107 = vector.shape_cast %106 : vector<1x1x32xf32> to vector<1x32xf32>
    %108 = vector.broadcast %107 : vector<1x32xf32> to vector<25x32xf32>
    %109 = arith.addf %105, %108 : vector<25x32xf32>
    %110 = arith.addf %3, %109 : vector<25x32xf32>
    %c0_46 = arith.constant 0 : index
    %c0_47 = arith.constant 0 : index
    %c0_48 = arith.constant 0 : index
    %111 = vector.load %arg18[%c0_46, %c0_47, %c0_48] : memref<1x1x32xf32, #tpu.memory_space<vmem>>, vector<1x1x32xf32>
    %112 = vector.shape_cast %111 : vector<1x1x32xf32> to vector<1x32xf32>
    %c0_49 = arith.constant 0 : index
    %c0_50 = arith.constant 0 : index
    %c0_51 = arith.constant 0 : index
    %113 = vector.load %arg19[%c0_49, %c0_50, %c0_51] : memref<1x1x32xf32, #tpu.memory_space<vmem>>, vector<1x1x32xf32>
    %114 = vector.shape_cast %113 : vector<1x1x32xf32> to vector<1x32xf32>
    %cst_52 = arith.constant dense<0.000000e+00> : vector<25xf32>
    %115 = vector.multi_reduction <add>, %110, %cst_52 [1] : vector<25x32xf32> to vector<25xf32>
    %116 = vector.shape_cast %115 : vector<25xf32> to vector<25x1xf32>
    %cst_53 = arith.constant 3.200000e+01 : f32
    %117 = vector.broadcast %cst_53 : f32 to vector<25x1xf32>
    %118 = arith.divf %116, %117 : vector<25x1xf32>
    %119 = vector.broadcast %118 : vector<25x1xf32> to vector<25x32xf32>
    %120 = arith.subf %110, %119 : vector<25x32xf32>
    %121 = arith.mulf %120, %120 : vector<25x32xf32>
    %cst_54 = arith.constant dense<0.000000e+00> : vector<25xf32>
    %122 = vector.multi_reduction <add>, %121, %cst_54 [1] : vector<25x32xf32> to vector<25xf32>
    %123 = vector.shape_cast %122 : vector<25xf32> to vector<25x1xf32>
    %cst_55 = arith.constant 3.200000e+01 : f32
    %124 = vector.broadcast %cst_55 : f32 to vector<25x1xf32>
    %125 = arith.divf %123, %124 : vector<25x1xf32>
    %126 = vector.broadcast %118 : vector<25x1xf32> to vector<25x32xf32>
    %127 = arith.subf %110, %126 : vector<25x32xf32>
    %cst_56 = arith.constant 9.99999974E-6 : f32
    %128 = vector.broadcast %cst_56 : f32 to vector<25x1xf32>
    %129 = arith.addf %125, %128 : vector<25x1xf32>
    %130 = math.rsqrt %129 : vector<25x1xf32>
    %131 = vector.broadcast %130 : vector<25x1xf32> to vector<25x32xf32>
    %132 = arith.mulf %127, %131 : vector<25x32xf32>
    %133 = vector.broadcast %112 : vector<1x32xf32> to vector<25x32xf32>
    %134 = arith.mulf %132, %133 : vector<25x32xf32>
    %135 = vector.broadcast %114 : vector<1x32xf32> to vector<25x32xf32>
    %136 = arith.addf %134, %135 : vector<25x32xf32>
    %137 = arith.truncf %136 : vector<25x32xf32> to vector<25x32xbf16>
    %c0_57 = arith.constant 0 : index
    %c0_58 = arith.constant 0 : index
    %c0_59 = arith.constant 0 : index
    %138 = vector.load %arg20[%c0_57, %c0_58, %c0_59] : memref<1x32x64xbf16, #tpu.memory_space<vmem>>, vector<1x32x64xbf16>
    %139 = vector.shape_cast %138 : vector<1x32x64xbf16> to vector<32x64xbf16>
    %cst_60 = arith.constant dense<0.000000e+00> : vector<25x64xf32>
    %140 = tpu.matmul %137, %139, %cst_60 {dimension_numbers = #tpu.dot_dimension_numbers<[1], [0], [0], [1], [0, 0, 1, 1], [], []>} : vector<25x32xbf16>, vector<32x64xbf16>, vector<25x64xf32> -> vector<25x64xf32>
    %c0_61 = arith.constant 0 : index
    %c0_62 = arith.constant 0 : index
    %c0_63 = arith.constant 0 : index
    %141 = vector.load %arg21[%c0_61, %c0_62, %c0_63] : memref<1x1x64xf32, #tpu.memory_space<vmem>>, vector<1x1x64xf32>
    %142 = vector.shape_cast %141 : vector<1x1x64xf32> to vector<1x64xf32>
    %143 = vector.broadcast %142 : vector<1x64xf32> to vector<25x64xf32>
    %144 = arith.addf %140, %143 : vector<25x64xf32>
    %cst_64 = arith.constant 0.000000e+00 : f32
    %145 = vector.broadcast %cst_64 : f32 to vector<25x64xf32>
    %146 = arith.maximumf %144, %145 : vector<25x64xf32>
    %147 = arith.truncf %146 : vector<25x64xf32> to vector<25x64xbf16>
    %c0_65 = arith.constant 0 : index
    %c0_66 = arith.constant 0 : index
    %c0_67 = arith.constant 0 : index
    %148 = vector.load %arg22[%c0_65, %c0_66, %c0_67] : memref<1x64x32xbf16, #tpu.memory_space<vmem>>, vector<1x64x32xbf16>
    %149 = vector.shape_cast %148 : vector<1x64x32xbf16> to vector<64x32xbf16>
    %cst_68 = arith.constant dense<0.000000e+00> : vector<25x32xf32>
    %150 = tpu.matmul %147, %149, %cst_68 {dimension_numbers = #tpu.dot_dimension_numbers<[1], [0], [0], [1], [0, 0, 1, 1], [], []>} : vector<25x64xbf16>, vector<64x32xbf16>, vector<25x32xf32> -> vector<25x32xf32>
    %c0_69 = arith.constant 0 : index
    %c0_70 = arith.constant 0 : index
    %c0_71 = arith.constant 0 : index
    %151 = vector.load %arg23[%c0_69, %c0_70, %c0_71] : memref<1x1x32xf32, #tpu.memory_space<vmem>>, vector<1x1x32xf32>
    %152 = vector.shape_cast %151 : vector<1x1x32xf32> to vector<1x32xf32>
    %153 = vector.broadcast %152 : vector<1x32xf32> to vector<25x32xf32>
    %154 = arith.addf %150, %153 : vector<25x32xf32>
    %155 = arith.addf %136, %154 : vector<25x32xf32>
    %c0_72 = arith.constant 0 : index
    %c0_73 = arith.constant 0 : index
    %c0_74 = arith.constant 0 : index
    %156 = vector.load %arg24[%c0_72, %c0_73, %c0_74] : memref<1x1x32xf32, #tpu.memory_space<vmem>>, vector<1x1x32xf32>
    %157 = vector.shape_cast %156 : vector<1x1x32xf32> to vector<1x32xf32>
    %c0_75 = arith.constant 0 : index
    %c0_76 = arith.constant 0 : index
    %c0_77 = arith.constant 0 : index
    %158 = vector.load %arg25[%c0_75, %c0_76, %c0_77] : memref<1x1x32xf32, #tpu.memory_space<vmem>>, vector<1x1x32xf32>
    %159 = vector.shape_cast %158 : vector<1x1x32xf32> to vector<1x32xf32>
    %cst_78 = arith.constant dense<0.000000e+00> : vector<25xf32>
    %160 = vector.multi_reduction <add>, %155, %cst_78 [1] : vector<25x32xf32> to vector<25xf32>
    %161 = vector.shape_cast %160 : vector<25xf32> to vector<25x1xf32>
    %cst_79 = arith.constant 3.200000e+01 : f32
    %162 = vector.broadcast %cst_79 : f32 to vector<25x1xf32>
    %163 = arith.divf %161, %162 : vector<25x1xf32>
    %164 = vector.broadcast %163 : vector<25x1xf32> to vector<25x32xf32>
    %165 = arith.subf %155, %164 : vector<25x32xf32>
    %166 = arith.mulf %165, %165 : vector<25x32xf32>
    %cst_80 = arith.constant dense<0.000000e+00> : vector<25xf32>
    %167 = vector.multi_reduction <add>, %166, %cst_80 [1] : vector<25x32xf32> to vector<25xf32>
    %168 = vector.shape_cast %167 : vector<25xf32> to vector<25x1xf32>
    %cst_81 = arith.constant 3.200000e+01 : f32
    %169 = vector.broadcast %cst_81 : f32 to vector<25x1xf32>
    %170 = arith.divf %168, %169 : vector<25x1xf32>
    %171 = vector.broadcast %163 : vector<25x1xf32> to vector<25x32xf32>
    %172 = arith.subf %155, %171 : vector<25x32xf32>
    %cst_82 = arith.constant 9.99999974E-6 : f32
    %173 = vector.broadcast %cst_82 : f32 to vector<25x1xf32>
    %174 = arith.addf %170, %173 : vector<25x1xf32>
    %175 = math.rsqrt %174 : vector<25x1xf32>
    %176 = vector.broadcast %175 : vector<25x1xf32> to vector<25x32xf32>
    %177 = arith.mulf %172, %176 : vector<25x32xf32>
    %178 = vector.broadcast %157 : vector<1x32xf32> to vector<25x32xf32>
    %179 = arith.mulf %177, %178 : vector<25x32xf32>
    %180 = vector.broadcast %159 : vector<1x32xf32> to vector<25x32xf32>
    %181 = arith.addf %179, %180 : vector<25x32xf32>
    %c0_83 = arith.constant 0 : index
    %c0_84 = arith.constant 0 : index
    %182 = vector.load %arg33[%c0_83, %c0_84] : memref<25x32xf32, #tpu.memory_space<vmem>>, vector<25x32xf32>
    tpu.vector_store %arg33[%c0_83, %c0_84], %181 {strides = array<i32>} : memref<25x32xf32, #tpu.memory_space<vmem>>, vector<25x32xf32>,
    %c1_i32 = arith.constant 1 : i32
    %183 = arith.cmpi eq, %arg1, %c1_i32 : i32
    %184 = arith.extui %183 : i1 to i32
    %c0_i32_85 = arith.constant 0 : i32
    %185 = arith.cmpi ne, %184, %c0_i32_85 : i32
    scf.if %185 {
      %186 = vector.extract_strided_slice %181 {offsets = [0, 0], sizes = [1, 32], strides = [1, 1]} : vector<25x32xf32> to vector<1x32xf32>
      %187 = arith.truncf %186 : vector<1x32xf32> to vector<1x32xbf16>
      %c0_86 = arith.constant 0 : index
      %c0_87 = arith.constant 0 : index
      %188 = vector.load %arg26[%c0_86, %c0_87] : memref<32x32xbf16, #tpu.memory_space<vmem>>, vector<32x32xbf16>
      %cst_88 = arith.constant dense<0.000000e+00> : vector<1x32xf32>
      %189 = tpu.matmul %187, %188, %cst_88 {dimension_numbers = #tpu.dot_dimension_numbers<[1], [0], [0], [1], [0, 0, 1, 1], [], []>} : vector<1x32xbf16>, vector<32x32xbf16>, vector<1x32xf32> -> vector<1x32xf32>
      %c0_89 = arith.constant 0 : index
      %c0_90 = arith.constant 0 : index
      %190 = vector.load %arg27[%c0_89, %c0_90] : memref<1x32xf32, #tpu.memory_space<vmem>>, vector<1x32xf32>
      %191 = arith.addf %189, %190 : vector<1x32xf32>
      %cst_91 = arith.constant 0.000000e+00 : f32
      %192 = vector.broadcast %cst_91 : f32 to vector<1x32xf32>
      %193 = arith.maximumf %191, %192 : vector<1x32xf32>
      %194 = arith.truncf %193 : vector<1x32xf32> to vector<1x32xbf16>
      %c0_92 = arith.constant 0 : index
      %c0_93 = arith.constant 0 : index
      %195 = vector.load %arg28[%c0_92, %c0_93] : memref<32x32xbf16, #tpu.memory_space<vmem>>, vector<32x32xbf16>
      %cst_94 = arith.constant dense<0.000000e+00> : vector<1x32xf32>
      %196 = tpu.matmul %194, %195, %cst_94 {dimension_numbers = #tpu.dot_dimension_numbers<[1], [0], [0], [1], [0, 0, 1, 1], [], []>} : vector<1x32xbf16>, vector<32x32xbf16>, vector<1x32xf32> -> vector<1x32xf32>
      %c0_95 = arith.constant 0 : index
      %c0_96 = arith.constant 0 : index
      %197 = vector.load %arg29[%c0_95, %c0_96] : memref<1x32xf32, #tpu.memory_space<vmem>>, vector<1x32xf32>
      %198 = arith.addf %196, %197 : vector<1x32xf32>
      %cst_97 = arith.constant 0.000000e+00 : f32
      %199 = vector.broadcast %cst_97 : f32 to vector<1x32xf32>
      %200 = arith.maximumf %198, %199 : vector<1x32xf32>
      %201 = arith.truncf %200 : vector<1x32xf32> to vector<1x32xbf16>
      %c0_98 = arith.constant 0 : index
      %c0_99 = arith.constant 0 : index
      %202 = vector.load %arg30[%c0_98, %c0_99] : memref<32x4xbf16, #tpu.memory_space<vmem>>, vector<32x4xbf16>
      %cst_100 = arith.constant dense<0.000000e+00> : vector<1x4xf32>
      %203 = tpu.matmul %201, %202, %cst_100 {dimension_numbers = #tpu.dot_dimension_numbers<[1], [0], [0], [1], [0, 0, 1, 1], [], []>} : vector<1x32xbf16>, vector<32x4xbf16>, vector<1x4xf32> -> vector<1x4xf32>
      %c0_101 = arith.constant 0 : index
      %c0_102 = arith.constant 0 : index
      %204 = vector.load %arg31[%c0_101, %c0_102] : memref<1x4xf32, #tpu.memory_space<vmem>>, vector<1x4xf32>
      %205 = arith.addf %203, %204 : vector<1x4xf32>
      %206 = arith.negf %205 : vector<1x4xf32>
      %207 = math.exp %206 : vector<1x4xf32>
      %cst_103 = arith.constant 1.000000e+00 : f32
      %208 = vector.broadcast %cst_103 : f32 to vector<1x4xf32>
      %209 = arith.addf %208, %207 : vector<1x4xf32>
      %210 = arith.divf %208, %209 : vector<1x4xf32>
      %c0_104 = arith.constant 0 : index
      %c0_105 = arith.constant 0 : index
      %c0_106 = arith.constant 0 : index
      %211 = vector.load %arg32[%c0_104, %c0_105, %c0_106] : memref<1x1x4xf32, #tpu.memory_space<vmem>>, vector<1x1x4xf32>
      %212 = vector.shape_cast %211 : vector<1x1x4xf32> to vector<1x4xf32>
      %213 = vector.shape_cast %210 : vector<1x4xf32> to vector<1x1x4xf32>
      tpu.vector_store %arg32[%c0_104, %c0_105, %c0_106], %213 {strides = array<i32>} : memref<1x1x4xf32, #tpu.memory_space<vmem>>, vector<1x1x4xf32>,
    } else {
    }
    return
  }
  func.func @transform_0(%arg0: i32, %arg1: i32) -> (i32, i32, i32) {
    %c0_i32 = arith.constant 0 : i32
    %c0_i32_0 = arith.constant 0 : i32
    %c0_i32_1 = arith.constant 0 : i32
    return %arg0, %c0_i32, %c0_i32_0 : i32, i32, i32
  }
  func.func @transform_1(%arg0: i32, %arg1: i32) -> (i32, i32, i32) {
    %c0_i32 = arith.constant 0 : i32
    %c0_i32_0 = arith.constant 0 : i32
    %c0_i32_1 = arith.constant 0 : i32
    return %arg0, %c0_i32, %c0_i32_0 : i32, i32, i32
  }
  func.func @transform_2(%arg0: i32, %arg1: i32) -> (i32, i32, i32) {
    %c0_i32 = arith.constant 0 : i32
    %c0_i32_0 = arith.constant 0 : i32
    %c0_i32_1 = arith.constant 0 : i32
    return %arg0, %c0_i32, %c0_i32_0 : i32, i32, i32
  }
  func.func @transform_3(%arg0: i32, %arg1: i32) -> (i32, i32, i32) {
    %c0_i32 = arith.constant 0 : i32
    %c0_i32_0 = arith.constant 0 : i32
    %c0_i32_1 = arith.constant 0 : i32
    return %arg0, %c0_i32, %c0_i32_0 : i32, i32, i32
  }
  func.func @transform_4(%arg0: i32, %arg1: i32) -> (i32, i32) {
    %c0_i32 = arith.constant 0 : i32
    %c0_i32_0 = arith.constant 0 : i32
    %c0_i32_1 = arith.constant 0 : i32
    return %c0_i32, %c0_i32_0 : i32, i32
  }
  func.func @transform_5(%arg0: i32, %arg1: i32) -> (i32, i32) {
    %c0_i32 = arith.constant 0 : i32
    %c0_i32_0 = arith.constant 0 : i32
    %c0_i32_1 = arith.constant 0 : i32
    return %c0_i32, %c0_i32_0 : i32, i32
  }
  func.func @transform_6(%arg0: i32, %arg1: i32) -> (i32, i32) {
    %c0_i32 = arith.constant 0 : i32
    %c0_i32_0 = arith.constant 0 : i32
    %c0_i32_1 = arith.constant 0 : i32
    return %c0_i32, %c0_i32_0 : i32, i32
  }
  func.func @transform_7(%arg0: i32, %arg1: i32) -> (i32, i32) {
    %c0_i32 = arith.constant 0 : i32
    %c0_i32_0 = arith.constant 0 : i32
    %c0_i32_1 = arith.constant 0 : i32
    return %c0_i32, %c0_i32_0 : i32, i32
  }
  func.func @transform_8(%arg0: i32, %arg1: i32) -> (i32, i32) {
    %c0_i32 = arith.constant 0 : i32
    %c0_i32_0 = arith.constant 0 : i32
    %c0_i32_1 = arith.constant 0 : i32
    return %c0_i32, %c0_i32_0 : i32, i32
  }
  func.func @transform_9(%arg0: i32, %arg1: i32) -> (i32, i32) {
    %c0_i32 = arith.constant 0 : i32
    %c0_i32_0 = arith.constant 0 : i32
    %c0_i32_1 = arith.constant 0 : i32
    return %c0_i32, %c0_i32_0 : i32, i32
  }
  func.func @transform_10(%arg0: i32, %arg1: i32) -> (i32, i32, i32) {
    %c0_i32 = arith.constant 0 : i32
    %c0_i32_0 = arith.constant 0 : i32
    %c0_i32_1 = arith.constant 0 : i32
    return %arg1, %c0_i32, %c0_i32_0 : i32, i32, i32
  }
  func.func @transform_11(%arg0: i32, %arg1: i32) -> (i32, i32, i32) {
    %c0_i32 = arith.constant 0 : i32
    %c0_i32_0 = arith.constant 0 : i32
    %c0_i32_1 = arith.constant 0 : i32
    return %arg1, %c0_i32, %c0_i32_0 : i32, i32, i32
  }
  func.func @transform_12(%arg0: i32, %arg1: i32) -> (i32, i32, i32) {
    %c0_i32 = arith.constant 0 : i32
    %c0_i32_0 = arith.constant 0 : i32
    %c0_i32_1 = arith.constant 0 : i32
    return %arg1, %c0_i32, %c0_i32_0 : i32, i32, i32
  }
  func.func @transform_13(%arg0: i32, %arg1: i32) -> (i32, i32, i32) {
    %c0_i32 = arith.constant 0 : i32
    %c0_i32_0 = arith.constant 0 : i32
    %c0_i32_1 = arith.constant 0 : i32
    return %arg1, %c0_i32, %c0_i32_0 : i32, i32, i32
  }
  func.func @transform_14(%arg0: i32, %arg1: i32) -> (i32, i32, i32) {
    %c0_i32 = arith.constant 0 : i32
    %c0_i32_0 = arith.constant 0 : i32
    %c0_i32_1 = arith.constant 0 : i32
    return %arg1, %c0_i32, %c0_i32_0 : i32, i32, i32
  }
  func.func @transform_15(%arg0: i32, %arg1: i32) -> (i32, i32, i32) {
    %c0_i32 = arith.constant 0 : i32
    %c0_i32_0 = arith.constant 0 : i32
    %c0_i32_1 = arith.constant 0 : i32
    return %arg1, %c0_i32, %c0_i32_0 : i32, i32, i32
  }
  func.func @transform_16(%arg0: i32, %arg1: i32) -> (i32, i32, i32) {
    %c0_i32 = arith.constant 0 : i32
    %c0_i32_0 = arith.constant 0 : i32
    %c0_i32_1 = arith.constant 0 : i32
    return %arg1, %c0_i32, %c0_i32_0 : i32, i32, i32
  }
  func.func @transform_17(%arg0: i32, %arg1: i32) -> (i32, i32, i32) {
    %c0_i32 = arith.constant 0 : i32
    %c0_i32_0 = arith.constant 0 : i32
    %c0_i32_1 = arith.constant 0 : i32
    return %arg1, %c0_i32, %c0_i32_0 : i32, i32, i32
  }
  func.func @transform_18(%arg0: i32, %arg1: i32) -> (i32, i32, i32) {
    %c0_i32 = arith.constant 0 : i32
    %c0_i32_0 = arith.constant 0 : i32
    %c0_i32_1 = arith.constant 0 : i32
    return %arg1, %c0_i32, %c0_i32_0 : i32, i32, i32
  }
  func.func @transform_19(%arg0: i32, %arg1: i32) -> (i32, i32, i32) {
    %c0_i32 = arith.constant 0 : i32
    %c0_i32_0 = arith.constant 0 : i32
    %c0_i32_1 = arith.constant 0 : i32
    return %arg1, %c0_i32, %c0_i32_0 : i32, i32, i32
  }
  func.func @transform_20(%arg0: i32, %arg1: i32) -> (i32, i32, i32) {
    %c0_i32 = arith.constant 0 : i32
    %c0_i32_0 = arith.constant 0 : i32
    %c0_i32_1 = arith.constant 0 : i32
    return %arg1, %c0_i32, %c0_i32_0 : i32, i32, i32
  }
  func.func @transform_21(%arg0: i32, %arg1: i32) -> (i32, i32, i32) {
    %c0_i32 = arith.constant 0 : i32
    %c0_i32_0 = arith.constant 0 : i32
    %c0_i32_1 = arith.constant 0 : i32
    return %arg1, %c0_i32, %c0_i32_0 : i32, i32, i32
  }
  func.func @transform_22(%arg0: i32, %arg1: i32) -> (i32, i32, i32) {
    %c0_i32 = arith.constant 0 : i32
    %c0_i32_0 = arith.constant 0 : i32
    %c0_i32_1 = arith.constant 0 : i32
    return %arg1, %c0_i32, %c0_i32_0 : i32, i32, i32
  }
  func.func @transform_23(%arg0: i32, %arg1: i32) -> (i32, i32, i32) {
    %c0_i32 = arith.constant 0 : i32
    %c0_i32_0 = arith.constant 0 : i32
    %c0_i32_1 = arith.constant 0 : i32
    return %arg1, %c0_i32, %c0_i32_0 : i32, i32, i32
  }
  func.func @transform_24(%arg0: i32, %arg1: i32) -> (i32, i32) {
    %c0_i32 = arith.constant 0 : i32
    %c0_i32_0 = arith.constant 0 : i32
    %c0_i32_1 = arith.constant 0 : i32
    return %c0_i32, %c0_i32_0 : i32, i32
  }
  func.func @transform_25(%arg0: i32, %arg1: i32) -> (i32, i32) {
    %c0_i32 = arith.constant 0 : i32
    %c0_i32_0 = arith.constant 0 : i32
    %c0_i32_1 = arith.constant 0 : i32
    return %c0_i32, %c0_i32_0 : i32, i32
  }
  func.func @transform_26(%arg0: i32, %arg1: i32) -> (i32, i32) {
    %c0_i32 = arith.constant 0 : i32
    %c0_i32_0 = arith.constant 0 : i32
    %c0_i32_1 = arith.constant 0 : i32
    return %c0_i32, %c0_i32_0 : i32, i32
  }
  func.func @transform_27(%arg0: i32, %arg1: i32) -> (i32, i32) {
    %c0_i32 = arith.constant 0 : i32
    %c0_i32_0 = arith.constant 0 : i32
    %c0_i32_1 = arith.constant 0 : i32
    return %c0_i32, %c0_i32_0 : i32, i32
  }
  func.func @transform_28(%arg0: i32, %arg1: i32) -> (i32, i32) {
    %c0_i32 = arith.constant 0 : i32
    %c0_i32_0 = arith.constant 0 : i32
    %c0_i32_1 = arith.constant 0 : i32
    return %c0_i32, %c0_i32_0 : i32, i32
  }
  func.func @transform_29(%arg0: i32, %arg1: i32) -> (i32, i32) {
    %c0_i32 = arith.constant 0 : i32
    %c0_i32_0 = arith.constant 0 : i32
    %c0_i32_1 = arith.constant 0 : i32
    return %c0_i32, %c0_i32_0 : i32, i32
  }
  func.func @transform_30(%arg0: i32, %arg1: i32) -> (i32, i32, i32) {
    %c0_i32 = arith.constant 0 : i32
    %c0_i32_0 = arith.constant 0 : i32
    %c0_i32_1 = arith.constant 0 : i32
    return %arg0, %c0_i32, %c0_i32_0 : i32, i32, i32
  }
}

</mosaic_0001>

<bundles_post_ra>
// kernel: transvg_forward.1
= control target key start
LH: loop header
LB: loop body
LE: loop exit
PB: predicated region body
PF: predicated region fallthrough
CT: control target
= control target key end

     0   :  { %s4395_s6 = smov 1   ;;  %s4396_s10 = smov 2   ;;  %s5288_s0 = inlined_call_operand.smem [shape: u32[31], index: -1, kind: input, shape index: {}] }
   0x1   :  { %s4456_s5 = sld [smem:[%s5288_s0]]   ;;  %s4397_s14 = smov 3  }
   0x2   :  { %s4461_s9 = sld [smem:[%s5288_s0 + %s4395_s6]]   ;;  %s4398_s18 = smov 4  }
   0x3   :  { %s4466_s13 = sld [smem:[%s5288_s0 + %s4396_s10]]   ;;  %s4399_s22 = smov 5  }
   0x4   :  { %s4471_s17 = sld [smem:[%s5288_s0 + %s4397_s14]]   ;;  %s4400_s26 = smov 6  }
   0x5   :  { %s4476_s21 = sld [smem:[%s5288_s0 + %s4398_s18]]   ;;  %s4401_s30 = smov 7  }
   0x6   :  { %s4481_s25 = sld [smem:[%s5288_s0 + %s4399_s22]]   ;;  %s4402_s4 = smov 8  }
   0x7   :  { %5325 = sst [smem:[#allocation19_spill]] %s4456_s5  ;;  %s4403_s10 = smov 9  }
   0x8   :  { %5326 = sst [smem:[#allocation20_spill]] %s4461_s9  ;;  %s4404_s15 = smov 10  }
   0x9   :  { %5327 = sst [smem:[#allocation21_spill]] %s4466_s13  ;;  %s4405_s20 = smov 11  }
   0xa   :  { %5328 = sst [smem:[#allocation22_spill]] %s4471_s17  ;;  %s4407_s1 = smov 13  }
   0xb   :  { %5329 = sst [smem:[#allocation23_spill]] %s4476_s21  ;;  %s4408_s7 = smov 14  }
   0xc   :  { %5330 = sst [smem:[#allocation24_spill]] %s4481_s25  ;;  %s4410_s22 = smov 16  }
   0xd   :  { %s4486_s29 = sld [smem:[%s5288_s0 + %s4400_s26]]   ;;  %s4406_s26 = smov 12  }
   0xe   :  { %s4491_s3 = sld [smem:[%s5288_s0 + %s4401_s30]]   ;;  %s4411_s28 = smov 17  }
   0xf   :  { %s4496_s8 = sld [smem:[%s5288_s0 + %s4402_s4]]  }
  0x10   :  { %s4501_s14 = sld [smem:[%s5288_s0 + %s4403_s10]]  }
  0x11   :  { %s4506_s19 = sld [smem:[%s5288_s0 + %s4404_s15]]   ;;  %s4409_s15 = smov 15  }
  0x12   :  { %s4511_s24 = sld [smem:[%s5288_s0 + %s4405_s20]]  }
  0x13   :  { %5331 = sst [smem:[#allocation25_spill]] %s4486_s29 }
  0x14   :  { %5332 = sst [smem:[#allocation26_spill]] %s4491_s3 }
  0x15   :  { %5333 = sst [smem:[#allocation27_spill]] %s4496_s8 }
  0x16   :  { %5334 = sst [smem:[#allocation28_spill]] %s4501_s14 }
  0x17   :  { %s4516_s30 = sld [smem:[%s5288_s0 + %s4406_s26]]  }
  0x18   :  { %s4521_s6 = sld [smem:[%s5288_s0 + %s4407_s1]]  }
  0x19   :  { %s4526_s12 = sld [smem:[%s5288_s0 + %s4408_s7]]   ;;  %s4412_s7 = smov 18  }
  0x1a   :  { %s4531_s20 = sld [smem:[%s5288_s0 + %s4409_s15]]   ;;  %s4413_s15 = smov 19  }
  0x1b   :  { %s4536_s27 = sld [smem:[%s5288_s0 + %s4410_s22]]   ;;  %s4414_s22 = smov 20  }
  0x1c   :  { %s4541_s4 = sld [smem:[%s5288_s0 + %s4411_s28]]   ;;  %s4415_s28 = smov 21  }
  0x1d   :  { %5335 = sst [smem:[#allocation29_spill]] %s4516_s30 }
  0x1e   :  { %5336 = sst [smem:[#allocation30_spill]] %s4521_s6 }
  0x1f   :  { %5337 = sst [smem:[#allocation31_spill]] %s4526_s12 }
  0x20   :  { %5338 = sst [smem:[#allocation32_spill]] %s4531_s20 }
  0x21   :  { %5339 = sst [smem:[#allocation33_spill]] %s4536_s27 }
  0x22   :  { %5340 = sst [smem:[#allocation34_spill]] %s4541_s4 }
  0x23   :  { %s4546_s25 = sld [smem:[%s5288_s0 + %s4412_s7]]   ;;  %s4416_s7 = smov 22  }
  0x24   :  { %s4551_s21 = sld [smem:[%s5288_s0 + %s4413_s15]]   ;;  %s4417_s15 = smov 23  }
  0x25   :  { %s4556_s14 = sld [smem:[%s5288_s0 + %s4414_s22]]   ;;  %s4418_s22 = smov 24  }
  0x26   :  { %s4561_s3 = sld [smem:[%s5288_s0 + %s4415_s28]]   ;;  %s4419_s28 = smov 25  }
  0x27   :  { %s4566_s29 = sld [smem:[%s5288_s0 + %s4416_s7]]   ;;  %s4420_s7 = smov 26  }
  0x28   :  { %s4571_s8 = sld [smem:[%s5288_s0 + %s4417_s15]]   ;;  %s4421_s15 = smov 27  }
  0x29   :  { %5341 = sst [smem:[#allocation35_spill]] %s4546_s25 }
  0x2a   :  { %5342 = sst [smem:[#allocation36_spill]] %s4551_s21 }
  0x2b   :  { %5343 = sst [smem:[#allocation37_spill]] %s4556_s14 }
  0x2c   :  { %5344 = sst [smem:[#allocation38_spill]] %s4561_s3 }
  0x2d   :  { %5345 = sst [smem:[#allocation39_spill]] %s4566_s29 }
  0x2e   :  { %5346 = sst [smem:[#allocation40_spill]] %s4571_s8 }
  0x2f   :  { %s4576_s14 = sld [smem:[%s5288_s0 + %s4418_s22]]   ;;  %s4422_s22 = smov 28  }
  0x30   :  { %s4581_s25 = sld [smem:[%s5288_s0 + %s4419_s28]]   ;;  %s4423_s28 = smov 29  }
  0x31   :  { %s4586_s29 = sld [smem:[%s5288_s0 + %s4420_s7]]   ;;  %s4424_s7 = smov 30  }
  0x32   :  { %s4591_s8 = sld [smem:[%s5288_s0 + %s4421_s15]]  }
  0x33   :  { %s4601_s4 = sld [smem:[%s5288_s0 + %s4423_s28]]  }
  0x35   :  { %5347 = sst [smem:[#allocation41_spill]] %s4576_s14 }
  0x36   :  { %5348 = sst [smem:[#allocation42_spill]] %s4581_s25 }
  0x37   :  { %5349 = sst [smem:[#allocation43_spill]] %s4586_s29 }
  0x38   :  { %5350 = sst [smem:[#allocation44_spill]] %s4591_s8 }
  0x39   :  { %s4596_s14 = sld [smem:[%s5288_s0 + %s4422_s22]]  }
  0x3a   :  { %5352 = sst [smem:[#allocation46_spill]] %s4601_s4 }
  0x3b   :  { %s4606_s29 = sld [smem:[%s5288_s0 + %s4424_s7]]  }
  0x3f   :  { %5351 = sst [smem:[#allocation45_spill]] %s4596_s14 }
  0x41   :  { %5353 = sst [smem:[#allocation47_spill]] %s4606_s29 }
  0x42   :  { %66 = vsyncpa [#allocation5], 0 }
  0x43   :  { %68 = vsyncpa [#allocation5 + $0x1], 0 }
  0x44   :  { %69 = vsyncpa [#allocation8], 0 }
  0x45   :  { %71 = vsyncpa [#allocation8 + $0x1], 0 }
  0x46   :  { %72 = vsyncpa [#allocation11], 0 }
  0x47   :  { %73 = vsyncpa [#allocation6], 0 }
  0x48   :  { %75 = vsyncpa [#allocation6 + $0x1], 0  ;;  %s4608_s15 = smov 0   ;;  %s4610_s16 = smov 0  }
  0x49   :  { %s4612_s18 = smov 0   ;;  %s4614_s22 = smov 0  }
  0x4a   :  { %s4616_s23 = smov 0   ;;  %s4618_s26 = smov 0  }
  0x4b   :  { %s4620_s0 = smov 0   ;;  %s4622_s28 = smov 0  }
  0x4c   :  { %s4624_s1 = smov 0   ;;  %s4626_s2 = smov 0  }
  0x4d   :  { %s4628_s7 = smov 0  }
  0x4e LB: > { %s5354_s3 = sld [smem:[#allocation38_spill]]  ;;  %s5355_s21 = sld [smem:[#allocation36_spill]]  ;;  %s4369_s23 = sphi %s4616_s23, %s5450_s23   ;;  %s4365_s22 = sphi %s4614_s22, %s5449_s22   ;;  %s4361_s18 = sphi %s4612_s18, %s5448_s18   ;;  %s4357_s16 = sphi %s4610_s16, %s5457_s16   ;;  %s4353_s15 = sphi %s4608_s15, %s5456_s15   ;;  %s4393_s7 = sphi %s4628_s7, %s81_s7   ;;  %s4389_s2 = sphi %s4626_s2, %s5455_s2   ;;  %s4385_s1 = sphi %s4624_s1, %s5454_s1   ;;  %s4381_s28 = sphi %s4622_s28, %s5453_s28   ;;  %s4377_s0 = sphi %s4620_s0, %s5452_s0   ;;  %s4373_s26 = sphi %s4618_s26, %s5451_s26  }
  0x4f   : > { %s5356_s25 = sld [smem:[#allocation42_spill]]  ;;  %s5357_s8 = sld [smem:[#allocation44_spill]] }
  0x50   : > { %s5358_s4 = sld [smem:[#allocation46_spill]]  ;;  %5359 = sst [smem:[#allocation48_spill]] %s4353_s15 }
  0x51   : > { %5360 = sst [smem:[#allocation49_spill]] %s4361_s18  ;;  %s4662_s10 = sadd.s32 4294967295, %s4393_s7  }
  0x52   : > { %5361 = sst [smem:[#allocation50_spill]] %s4369_s23  ;;  %s3446_s11 = sadd.s32 4294967294, %s4393_s7  }
  0x53   : > { %5362 = sst [smem:[#allocation51_spill]] %s4373_s26  ;;  %p577_p0 = scmp.ne.s32.totalorder %s4369_s23, %s4365_s22 }
  0x54   : > { %5363 = sst [smem:[#allocation52_spill]] %s4377_s0  ;;  %p5300_p1 = scmp.eq.s32.totalorder %s4662_s10, 0 }
  0x55   : > { %5364 = sst [smem:[#allocation53_spill]] %s4381_s28  ;;  %p830_p2 = scmp.ne.s32.totalorder %s4361_s18, %s4357_s16 }
  0x56   : > { %5365 = sst [smem:[#allocation54_spill]] %s4385_s1  ;;  %p4672_p3 = por %p5300_p1, %p577_p0 }
  0x57   : > { %5366 = sst [smem:[#allocation55_spill]] %s4389_s2  ;;  %p831_p4 = scmp.eq.s32.totalorder %s4662_s10, 3 }
  0x58   : > { %5367 = sst [smem:[#allocation56_spill]] %s4393_s7  ;;  %p836_p5 = scmp.ne.s32.totalorder %s4357_s16, %s4353_s15 }
  0x59   : > { %s5368_s14 = scalar_select %p4672_p3, 1, 0 }
  0x5a   : > { %p837_p6 = scmp.eq.s32.totalorder %s3446_s11, 3  ;;  %p4679_p7 = por %p831_p4, %p830_p2 }
  0x5b   : > { %p3447_p8 = scmp.ge.s32.totalorder %s4393_s7, 1  ;;  %p844_p10 = scmp.lt.s32.totalorder %s4393_s7, 5 }
  0x5c   : > { %s5369_s27 = scalar_select %p4679_p7, 1, 0 }
  0x5d   : > { %p4684_p9 = por %p837_p6, %p836_p5  ;;  %p4689_p11 = pnand %p3447_p8, %p844_p10 }
  0x5e   : > { %5370 = sst [smem:[#allocation57_spill]] %s5369_s27  ;;  %s4425_s20 = smov [#allocation9]  }
  0x5f   : > { %s5371_s22 = scalar_select %p4684_p9, 1, 0 }
  0x60   : > { %s5373_s29 = scalar_select %p4689_p11, 1, 0 }
  0x61   : > { %5372 = sst [smem:[#allocation58_spill]] %s5371_s22  ;;  %s878_s11 = sshll.u32 %s4425_s20, 4  ;;  %s879_s11 = int_to_ptr.vmem [resolvable:$true] %s878_s11 }
  0x62   : > { %p3805_p12 = pneg %p4689_p11  ;;  %s4426_s15 = smov [#allocation10]  }
  0x63   : > { %s892_s27 = sshll.u32 %s4426_s15, 4  ;;  %s4427_s22 = smov [#allocation12]   ;;  %s4701_s27 = int_to_ptr.vmem [resolvable:$true] %s892_s27 }
  0x64   : > { %p4697_p13 = pnand %p3805_p12, %p5300_p1  ;;  %s906_s6 = sshll.u32 %s4427_s22, 4  ;;  %s4703_s6 = int_to_ptr.vmem [resolvable:$true] %s906_s6 }
  0x65   : > { %s4115_s30 = scalar_lea.hbm %s5356_s25, 16 }
  0x66   : > { %p4116_p0 = scmp.ne.s32.totalorder %s5356_s25, %s4115_s30  ;;  %p4709_p2 = pneg %p4697_p13 }
  0x67   : > { %p4122_p6 = scmp.lt.u32.totalorder %s4115_s30, %s5356_s25 }
  0x68   : > { %p4118_p4 = pnand %p4709_p2, %p4116_p0 }
  0x6a   : > { %p4119_p5 = pneg %p4118_p4 }
  0x6c   : > { %p4124_p8 = pnand %p4122_p6, %p4119_p5 }
  0x6e   : > { %4127 = shalt.err (!%p4124_p8)
}
  0x6f   : > { %s4128_s15 = scalar_lea.vmem %s879_s11, 16  ;;  %s4135_s22 = scalar_lea.vmem %s879_s11, 32 }
  0x70   : > { %p4129_p10 = scmp.ne.s32.totalorder %s879_s11, %s4128_s15  ;;  %p4136_p9 = scmp.lt.s32.totalorder %s879_s11, %s879_s11 }
  0x71   : > { %p4137_p7 = scmp.lt.s32.totalorder %s4135_s22, %s4128_s15 }
  0x72   : > { %p4131_p12 = pnand %p4129_p10, %p4709_p2 }
  0x73   : > { %p4138_p3 = por %p4137_p7, %p4136_p9 }
  0x74   : > { %p4132_p1 = pneg %p4131_p12 }
  0x76   : > { %p4139_p11 = pnand %p4138_p3, %p4132_p1 }
  0x78   : > { %4142 = shalt.err (!%p4139_p11)
}
  0x79   : > { %3808 = dma.hbm_to_vmem [thread:$0]  (!%p4697_p13), %s5356_s25, 16, %s879_s11, [#allocation8]  }
  0x7a   : > { %s4143_s30 = scalar_lea.hbm %s5357_s8, 16 }
  0x7b   : > { %p4144_p0 = scmp.ne.s32.totalorder %s5357_s8, %s4143_s30  ;;  %p4150_p6 = scmp.lt.u32.totalorder %s4143_s30, %s5357_s8 }
  0x7d   : > { %p4146_p4 = pnand %p4144_p0, %p4709_p2 }
  0x7f   : > { %p4147_p5 = pneg %p4146_p4 }
  0x81   : > { %p4152_p8 = pnand %p4150_p6, %p4147_p5 }
  0x83   : > { %4155 = shalt.err (!%p4152_p8)
}
  0x84   : > { %s4156_s15 = scalar_lea.vmem %s4701_s27, 16  ;;  %s4163_s22 = scalar_lea.vmem %s4701_s27, 32 }
  0x85   : > { %p4157_p1 = scmp.ne.s32.totalorder %s4701_s27, %s4156_s15  ;;  %p4164_p9 = scmp.lt.s32.totalorder %s4701_s27, %s4701_s27 }
  0x86   : > { %p4165_p11 = scmp.lt.s32.totalorder %s4163_s22, %s4156_s15 }
  0x87   : > { %p4159_p3 = pnand %p4157_p1, %p4709_p2 }
  0x88   : > { %p4166_p10 = por %p4165_p11, %p4164_p9 }
  0x89   : > { %p4160_p7 = pneg %p4159_p3 }
  0x8b   : > { %p4167_p12 = pnand %p4166_p10, %p4160_p7 }
  0x8d   : > { %4170 = shalt.err (!%p4167_p12)
}
  0x8e   : > { %3811 = dma.hbm_to_vmem [thread:$0]  (!%p4697_p13), %s5357_s8, 16, %s4701_s27, [#allocation11]  }
  0x8f   : > { %s4171_s11 = scalar_lea.hbm %s5358_s4, 16 }
  0x90   : > { %p4172_p0 = scmp.ne.s32.totalorder %s5358_s4, %s4171_s11  ;;  %p4178_p6 = scmp.lt.u32.totalorder %s4171_s11, %s5358_s4 }
  0x92   : > { %p4174_p4 = pnand %p4172_p0, %p4709_p2 }
  0x94   : > { %p4175_p5 = pneg %p4174_p4 }
  0x96   : > { %p4180_p8 = pnand %p4178_p6, %p4175_p5 }
  0x98   : > { %4183 = shalt.err (!%p4180_p8)
}
  0x99   : > { %s4184_s30 = scalar_lea.vmem %s4703_s6, 16  ;;  %s4191_s15 = scalar_lea.vmem %s4703_s6, 32 }
  0x9a   : > { %p4185_p1 = scmp.ne.s32.totalorder %s4703_s6, %s4184_s30  ;;  %p4192_p9 = scmp.lt.s32.totalorder %s4703_s6, %s4703_s6 }
  0x9b   : > { %p4193_p11 = scmp.lt.s32.totalorder %s4191_s15, %s4184_s30 }
  0x9c   : > { %p4187_p3 = pnand %p4185_p1, %p4709_p2 }
  0x9d   : > { %p4194_p10 = por %p4193_p11, %p4192_p9 }
  0x9e   : > { %p4188_p7 = pneg %p4187_p3 }
  0xa0   : > { %p4195_p12 = pnand %p4194_p10, %p4188_p7 }
  0xa2   : > { %4198 = shalt.err (!%p4195_p12)
}
  0xa3   : > { %3814 = dma.hbm_to_vmem [thread:$0]  (!%p4697_p13), %s5358_s4, 16, %s4703_s6, [#allocation11]  }
  0xa4   : > { %s90_s27 = sadd.s32 1, %s4385_s1  ;;  %s93_s20 = sadd.s32 1, %s4389_s2 }
  0xa5   : > { %p91_p2 = scmp.ge.s32.totalorder %s90_s27, 2  ;;  %s564_s12 = sadd.s32 1, %s4373_s26 }
  0xa6   : > { %p571_p0 = scmp.ne.s32.totalorder %s4373_s26, %s4369_s23  ;;  %p572_p4 = scmp.eq.s32.totalorder %s4393_s7, 0 }
  0xa7   : > { %s5459_s27 = smov (%p91_p2, %s90_s27), 0  ;;  %s5461_s20 = smov (!%p91_p2, %s93_s20), %s4389_s2 }
  0xa8   : > { %5376 = sst [smem:[#allocation59_spill]] %s5459_s27  ;;  %s561_s22 = ssub.s32 %s4385_s1, %s5459_s27 }
  0xa9   : > { %p95_p5 = scmp.ge.s32.totalorder %s5461_s20, 2  ;;  %p562_p13 = scmp.eq.s32.totalorder %s561_s22, 0 }
  0xaa   : > { %p4764_p6 = por %p572_p4, %p571_p0  ;;  %p3829_p8 = scmp.lt.s32.totalorder %s4393_s7, 4 }
  0xab   : > { %s5463_s20 = smov (%p95_p5, %s5461_s20), 0  ;;  %s4777_s15 = sand.u32 1, %s4373_s26  }
  0xac   : > { %5378 = sst [smem:[#allocation60_spill]] %s5463_s20  ;;  %s817_s30 = ssub.s32 %s4389_s2, %s5463_s20 }
  0xad   : > { %s4772_s11 = scalar_select %p562_p13, %s4373_s26, %s564_s12  }
  0xae   : > { %p818_p1 = scmp.eq.s32.totalorder %s817_s30, 0  ;;  %s3452_s22 = sshll.u32 %s4385_s1, 4 }
  0xaf   : > { %5379 = sst [smem:[#allocation61_spill]] %s4772_s11  ;;  %s5380_s4 = sadd.s32 1, %s4361_s18 }
  0xb0   : > { %s4783_s8 = scalar_select %p818_p1, %s4361_s18, %s5380_s4  }
  0xb1   : > { %s4786_s25 = scalar_lea.hbm %s5355_s21, %s3452_s22  ;;  %s1009_s27 = scalar_lea.vmem [#allocation4], %s4777_s15 }
  0xb2   : > { %5381 = sst [smem:[#allocation62_spill]] %s4783_s8  ;;  %s1016_s12 = sshll.u32 %s1009_s27, 4  ;;  %s4789_s12 = int_to_ptr.vmem [resolvable:$true] %s1016_s12 }
  0xb3   : > { %p4793_p3 = pnand %p3829_p8, %p4764_p6  ;;  %s4799_s4 = scalar_lea.hbm %s5354_s3, %s3452_s22 }
  0xb4   : > { %s1007_s2 = scalar_lea.sflag [#allocation5], %s4777_s15  ;;  %s4199_s1 = scalar_lea.hbm %s4786_s25, 16 }
  0xb5   : > { %p4200_p7 = scmp.ne.s32.totalorder %s4786_s25, %s4199_s1  ;;  %p4201_p9 = pneg %p4793_p3 }
  0xb6   : > { %s4204_s27 = scalar_lea.hbm %s5355_s21, 32  ;;  %p4205_p12 = scmp.lt.u32.totalorder %s4786_s25, %s5355_s21 }
  0xb7   : > { %p4202_p11 = pnand %p4201_p9, %p4200_p7  ;;  %p4206_p2 = scmp.lt.u32.totalorder %s4204_s27, %s4199_s1 }
  0xb8   : > { %p4208_p4 = scmp.lt.u32.totalorder %s4199_s1, %s4786_s25 }
  0xb9   : > { %p4203_p10 = pneg %p4202_p11  ;;  %p4207_p0 = por %p4206_p2, %p4205_p12 }
  0xbb   : > { %p4209_p5 = por %p4208_p4, %p4207_p0 }
  0xbd   : > { %p4210_p13 = pnand %p4209_p5, %p4203_p10 }
  0xbf   : > { %4213 = shalt.err (!%p4210_p13)
}
  0xc0   : > { %s4214_s6 = scalar_lea.vmem %s4789_s12, 16  ;;  %s4428_s22 = smov [#allocation4]  }
  0xc1   : > { %p4215_p6 = scmp.ne.s32.totalorder %s4789_s12, %s4214_s6  ;;  %s4219_s30 = sshll.u32 %s4428_s22, 4  ;;  %s4220_s30 = int_to_ptr.vmem [resolvable:$false] %s4219_s30 }
  0xc2   : > { %s4221_s21 = scalar_lea.vmem %s4220_s30, 32  ;;  %p4222_p7 = scmp.lt.s32.totalorder %s4789_s12, %s4220_s30 }
  0xc3   : > { %p4217_p8 = pnand %p4215_p6, %p4201_p9  ;;  %p4223_p11 = scmp.lt.s32.totalorder %s4221_s21, %s4214_s6 }
  0xc5   : > { %p4218_p1 = pneg %p4217_p8  ;;  %p4224_p12 = por %p4223_p11, %p4222_p7 }
  0xc7   : > { %p4225_p2 = pnand %p4224_p12, %p4218_p1 }
  0xc9   : > { %4228 = shalt.err (!%p4225_p2)
}
  0xca   : > { %3818 = dma.hbm_to_vmem [thread:$0]  (!%p4793_p3), %s4786_s25, 16, %s4789_s12, %s1007_s2  }
  0xcb   : > { %s1034_s1 = scalar_lea.vmem [#allocation7], %s4777_s15  ;;  %s5383_s21 = sand.u32 1, %s4393_s7  }
  0xcc   : > { %s1041_s30 = sshll.u32 %s1034_s1, 4  ;;  %s1032_s27 = scalar_lea.sflag [#allocation8], %s5383_s21  ;;  %s1042_s30 = int_to_ptr.vmem [resolvable:$true] %s1041_s30 }
  0xcd   : > { %s4229_s6 = scalar_lea.hbm %s4799_s4, 16  ;;  %s4234_s22 = scalar_lea.hbm %s5354_s3, 32 }
  0xce   : > { %p4230_p10 = scmp.ne.s32.totalorder %s4799_s4, %s4229_s6  ;;  %p4235_p5 = scmp.lt.u32.totalorder %s4799_s4, %s5354_s3 }
  0xcf   : > { %p4236_p13 = scmp.lt.u32.totalorder %s4234_s22, %s4229_s6  ;;  %p4238_p8 = scmp.lt.u32.totalorder %s4229_s6, %s4799_s4 }
  0xd0   : > { %p4232_p0 = pnand %p4230_p10, %p4201_p9 }
  0xd1   : > { %p4237_p6 = por %p4236_p13, %p4235_p5 }
  0xd2   : > { %p4233_p4 = pneg %p4232_p0 }
  0xd3   : > { %p4239_p1 = por %p4238_p8, %p4237_p6 }
  0xd5   : > { %p4240_p7 = pnand %p4239_p1, %p4233_p4 }
  0xd7   : > { %4243 = shalt.err (!%p4240_p7)
}
  0xd8   : > { %s4244_s25 = scalar_lea.vmem %s1042_s30, 16  ;;  %s4429_s2 = smov [#allocation7]  }
  0xd9   : > { %p4245_p11 = scmp.ne.s32.totalorder %s1042_s30, %s4244_s25  ;;  %s4249_s15 = sshll.u32 %s4429_s2, 4  ;;  %s4250_s15 = int_to_ptr.vmem [resolvable:$false] %s4249_s15 }
  0xda   : > { %s4251_s12 = scalar_lea.vmem %s4250_s15, 32  ;;  %p4252_p10 = scmp.lt.s32.totalorder %s1042_s30, %s4250_s15 }
  0xdb   : > { %p4247_p12 = pnand %p4245_p11, %p4201_p9  ;;  %p4253_p0 = scmp.lt.s32.totalorder %s4251_s12, %s4244_s25 }
  0xdd   : > { %p4248_p2 = pneg %p4247_p12  ;;  %p4254_p5 = por %p4253_p0, %p4252_p10 }
  0xdf   : > { %p4255_p13 = pnand %p4254_p5, %p4248_p2 }
  0xe1   : > { %4258 = shalt.err (!%p4255_p13)
}
  0xe2   : > { %3821 = dma.hbm_to_vmem [thread:$0]  (!%p4793_p3), %s4799_s4, 16, %s1042_s30, %s1032_s27  }
  0xe3   : > { %p5384_p4 = scmp.ne.s32.totalorder %s5373_s29, 0 }
  0xe5   : > { %1062 = sbr.rel (%p5384_p4) target bundleno = 4803 (0x12c3), region = 140 }
  0xec   : > { %s4844_s1 = sand.u32 1, %s4369_s23   ;;  %p5386_p9 = scmp.ne.s32.totalorder %s5368_s14, 0 }
  0xed   : > { %5385 = sst [smem:[#allocation63_spill]] %s4844_s1  ;;  %s1065_s21 = scalar_lea.sflag [#allocation5], %s4844_s1 }
  0xee   : > { %4332 = dma.done.wait (%p5386_p9), %s1065_s21, 16  }
  0xef   : > { %4334 = vsyncadd (%p5386_p9), %s1065_s21, 4294967280  ;;  %s1072_s20 = sand.u32 1, %s4662_s10  }
  0xf0   : > { %s1073_s4 = scalar_lea.sflag [#allocation8], %s1072_s20 }
  0xf1   : > { %4336 = dma.done.wait (%p5386_p9), %s1073_s4, 16  }
  0xf2   : > { %4338 = vsyncadd (%p5386_p9), %s1073_s4, 4294967280  ;;  %p5387_p3 = scmp.eq.s32.totalorder %s4662_s10, 0 }
  0xf4   : > { %4340 = dma.done.wait (%p5387_p3), [#allocation8], 16   ;;  %p5388_p6 = pmov %p5387_p3 }
  0xf5   : > { %p5389_p8 = pmov %p5387_p3 }
  0xf6   : > { %4342 = vsyncadd (%p5388_p6), [#allocation8], 4294967280 }
  0xf7   : > { %4344 = dma.done.wait (%p5389_p8), [#allocation11], 32   ;;  %p5390_p1 = pmov %p5387_p3 }
  0xf8   : > { %s5393_s13 = sld [smem:[#allocation21_spill]]  ;;  %s5394_s17 = sld [smem:[#allocation22_spill]] }
  0xf9   : > { %4346 = vsyncadd (%p5390_p1), [#allocation11], 4294967264  ;;  %s5395_s14 = sld [smem:[#allocation29_spill]]  ;;  %s5396_s30 = sld [smem:[#allocation30_spill]] }
  0xfa   : > { %s5397_s22 = sld [smem:[#allocation31_spill]]  ;;  %p1227_p7 = scmp.lt.s32.totalorder %s4381_s28, 1 }
  0xfb   : > { %s5398_s25 = sld [smem:[#allocation32_spill]]  ;;  %p1242_p11 = scmp.lt.s32.totalorder %s4377_s0, 1 }
  0xfc   : > { %s5399_s10 = sld [smem:[#allocation33_spill]]  ;;  %s5401_s15 = sld [smem:[#allocation34_spill]] }
  0xfd   : > { %s4870_s2 = scalar_select %p1227_p7, %s4381_s28, 1 }
  0xfe   : > { %s4873_s12 = scalar_select %p1242_p11, %s4377_s0, 1 }
  0xff   : > { %5400 = sst [smem:[#allocation64_spill]] %s4870_s2  ;;  %s5402_s21 = sld [smem:[#allocation35_spill]] }
 0x100   : > { %s5403_s29 = sld [smem:[#allocation39_spill]]  ;;  %s3458_s6 = sshll.u32 %s4870_s2, 3 }
 0x101   : > { %s5404_s27 = sld [smem:[#allocation37_spill]]  ;;  %s3547_s3 = sshll.u32 %s4870_s2, 4 }
 0x102   : > { %s5405_s11 = sld [smem:[#allocation40_spill]]  ;;  %s4882_s26 = scalar_lea.vmem %s5393_s13, %s3458_s6 }
 0x103   : > { %s4885_s23 = scalar_lea.vmem %s5394_s17, %s3547_s3  ;;  %s3548_s8 = sshll.u32 %s4873_s12, 4 }
 0x104   : > { %5406 = sst [smem:[#allocation65_spill]] %s4885_s23  ;;  %s4891_s7 = scalar_lea.vmem %s4506_s19, %s3548_s8 }
 0x105   : > { %s4894_s28 = scalar_lea.vmem %s5395_s14, %s3548_s8  ;;  %s1257_s20 = scalar_lea.vmem %s5396_s30, %s4873_s12 }
 0x106   : > { %s4899_s4 = scalar_lea.vmem %s5397_s22, %s3548_s8  ;;  %s1265_s1 = scalar_lea.vmem %s5398_s25, %s4873_s12 }
 0x107   : > { %s1268_s9 = scalar_lea.vmem %s5399_s10, %s4873_s12  ;;  %s1271_s5 = scalar_lea.vmem %s5401_s15, %s4873_s12 }
 0x108   : > { %s4908_s2 = scalar_lea.vmem %s5402_s21, %s3548_s8  ;;  %s3552_s0 = sshll.u32 %s4873_s12, 5 }
 0x109   : > { %s1284_s6 = scalar_lea.vmem %s5403_s29, %s4873_s12  ;;  %s4914_s13 = scalar_lea.vmem %s5404_s27, %s3552_s0 }
 0x10a   : > { %s1287_s3 = scalar_lea.vmem %s5405_s11, %s4873_s12  ;;  %s5407_s17 = sand.u32 1, %s4357_s16  }
 0x10b   : > { %s4920_s23 = scalar_lea.vmem [#allocation13], %s5407_s17  ;;  %s5408_s18 = sld [smem:[#allocation52_spill]] }
 0x111   : > { %p3471_p12 = scmp.ne.s32.totalorder %s5408_s18, 0 }
 0x112   : > { %s5409_s14 = sld [smem:[#allocation27_spill]] (!%p3471_p12)  ;;  %s5410_s30 = sld [smem:[#allocation25_spill]] (!%p3471_p12)  ;;  %v4430_v1 = vmov (!%p3471_p12), 0.0   ;;  %vm4431_vm0 = vmmov (!%p3471_p12), 0   ;;  %v1293_v7 = vld [vmem:[%s4882_s26] sm:$0xff] (!%p3471_p12)  ;;  %vm1326_vm1 = vcmask (!%p3471_p12), 392192  }
 0x113   : > { %1292 = sbr.rel (%p3471_p12) target bundleno = 516 (0x204), region = 164  ;;  %3635 = vmatprep.subr.bf16.mxu1 (!%p3471_p12), %v4430_v1  ;;  %3625 = vmatprep.subr.bf16.mxu0 (!%p3471_p12), %v4430_v1  ;;  %s5411_s8 = sld [smem:[#allocation19_spill]] (!%p3471_p12)  ;;  %v1294_v10 = vpack.c.bf16 (!%p3471_p12), %v1293_v7, %v1293_v7  ;;  %vm1412_vm2 = vcmask (!%p3471_p12), 523264   ;;  %vm1496_vm3 = vcmask (!%p3471_p12), 7168   ;;  %vm1498_vm4 = vcmask (!%p3471_p12), 72704  }
 0x114   : > { %s5412_s0 = sld [smem:[#allocation64_spill]] (!%p3471_p12)  ;;  %3631 = vmatprep.mubr.msk.bf16.mxu0 (!%p3471_p12), %vm4431_vm0, %v4430_v1  ;;  %s5413_s17 = sld [smem:[#allocation65_spill]] (!%p3471_p12)  ;;  %3643 = vmatprep.mubr.msk.bf16.mxu1 (!%p3471_p12), %vm4431_vm0, %v4430_v1  ;;  %vm1501_vm5 = vcmask (!%p3471_p12), 196608   ;;  %vm1463_vm6 = vcmask (!%p3471_p12), 1040384   ;;  %vm1472_vm7 = vcmask (!%p3471_p12), 261120   ;;  %vm1476_vm8 = vcmask (!%p3471_p12), 253952  }
 0x115   : > { %s5414_s18 = sld [smem:[#allocation20_spill]] (!%p3471_p12)  ;;  %s4432_s29 = smov (!%p3471_p12), 1  }
 0x116   : > { %s5417_s22 = sld [smem:[#allocation26_spill]] (!%p3471_p12)  ;;  %s4433_s25 = smov (!%p3471_p12), 9  }
 0x117   : > { %s5418_s26 = sld [smem:[#allocation28_spill]] (!%p3471_p12)  ;;  %s5419_s10 = sld [smem:[#allocation23_spill]] (!%p3471_p12) }
 0x118   : > { %v3972_v0 = vld [vmem:[%s5409_s14] sm:$0xff] (!%p3471_p12)   ;;  %v3974_v3 = vld [vmem:[%s5409_s14 + $0x8] sm:$0xff] (!%p3471_p12)   ;;  %v3976_v5 = vld [vmem:[%s5409_s14 + $0x10] sm:$0xff] (!%p3471_p12)  }
 0x119   : > { %v3973_v2 = vld [vmem:[%s5410_s30] sm:$0xff] (!%p3471_p12)   ;;  %3636 = vmatpush3.bf16.msra.mxu1 (!%p3471_p12), %v3972_v0  ;;  %v3975_v4 = vld [vmem:[%s5410_s30 + $0x8] sm:$0xff] (!%p3471_p12)   ;;  %v3977_v6 = vld [vmem:[%s5410_s30 + $0x10] sm:$0xff] (!%p3471_p12)  }
 0x11a   : > { %3626 = vmatpush3.bf16.msra.mxu0 %v3973_v2  ;;  %3637 = vmatprep.subr.bf16.mxu1 %v4430_v1  ;;  %s5415_s11 = scalar_lea.vmem %s5411_s8, %s5412_s0  ;;  %v3978_v9 = vld [vmem:[%s5409_s14 + $0x18] sm:$0xff]   ;;  %v1370_v11 = vld [vmem:[%s5413_s17] sm:$0xff]  ;;  %v1371_v12 = vld [vmem:[%s5413_s17 + $0x8] sm:$0xff] }
 0x11b   : > { %3627 = vmatprep.subr.bf16.mxu0 %v4430_v1  ;;  %v3483_v8 = vld [vmem:[%s5415_s11] ss:$0 sm:$0xff]  ;;  %s5416_s27 = scalar_lea.vmem %s5414_s18, %s5412_s0  ;;  %v1372_v14 = vpack.c.bf16 %v1371_v12, %v1370_v11 }
 0x11c   : > { %1485 = vrot.lane.b32.xlu0 %v3483_v8, %s4432_s29  ;;  %v3484_v13 = vld [vmem:[%s5416_s27] ss:$0 sm:$0xff] }
 0x11d   : > { %3638 = vmatpush3.bf16.msra.mxu1 %v3974_v3  ;;  %v3472_v20 = vld [vmem:[%s5417_s22] ss:$0 sm:$0xff] }
 0x11e   : > { %3628 = vmatpush3.bf16.msra.mxu0 %v3975_v4  ;;  %3639 = vmatprep.subr.bf16.mxu1 %v4430_v1  ;;  %v3477_v24 = vld [vmem:[%s5418_s26] ss:$0 sm:$0xff] }
 0x11f   : > { %3629 = vmatprep.subr.bf16.mxu0 %v4430_v1  ;;  %v1457_v25 = vld [vmem:[%s5419_s10] sm:$0x1] }
 0x120   : > { %1493 = vrot.lane.b32.xlu0 %v3484_v13, %s4433_s25 }
 0x121   : > { %3640 = vmatpush3.bf16.msra.mxu1 %v3976_v5 }
 0x122   : > { %3630 = vmatpush3.bf16.msra.mxu0 %v3977_v6  ;;  %3641 = vmatprep.subr.bf16.mxu1 %v4430_v1 }
 0x125   : > { %3642 = vmatpush3.bf16.msra.mxu1 %v3978_v9  ;;  %3632 = vmatmul.mubr.msk.bf16.vlgmr.msra.gmra.mrb[0].mxu0 %vm1326_vm1, %v1294_v10 }
 0x128   : > { %3644 = vmatmul.mubr.msk.bf16.vlgmr.msra.gmra.mrb[0].mxu1 %vm1412_vm2, %v1372_v14 }
 0x18e   : > { %v1486_v15 = vpop.permute.xlu0 %1485 }
 0x18f   : > { %v1497_v16 = vsel %vm1496_vm3, 0.0, %v1486_v15 }
 0x192   : > { %v1494_v17 = vpop.permute.xlu0 %1493 }
 0x193   : > { %v1499_v18 = vsel %vm1498_vm4, %v1497_v16, %v1494_v17 }
 0x194   : > { %v1500_v19 = vmul.f32 -1e+30, %v1499_v18 }
 0x196   : > { %1502 = vst.msk [vmem:[#allocation3] sm:$0x1] %vm1501_vm5, %v1500_v19 }
 0x1f8   : > { %v1364_v21 = vpop.f32.mrb[0].mxu0 }
 0x1f9   : > { %v1365_v22 = vadd.f32 %v3472_v20, %v1364_v21  ;;  %v3633_v23 = vpop.f32.mrb[1].mxu0 }
 0x1fa   : > { %v1367_v26 = vpop.f32.mrb[2].mxu0 }
 0x1fb   : > { %v1459_v27 = vrot.slane %v1365_v22, 7  ;;  %v1450_v28 = vpop.f32.mrb[0].mxu1  ;;  %v3634_v29 = vpop.f32.mrb[3].mxu0 }
 0x1fc   : > { %v1451_v30 = vadd.f32 %v3477_v24, %v1450_v28  ;;  %v3645_v31 = vpop.f32.mrb[1].mxu1 }
 0x1fd   : > { %v1470_v32 = vsel %vm1463_vm6, %v1457_v25, %v1459_v27  ;;  %v1453_v33 = vpop.f32.mrb[2].mxu1 }
 0x1fe   : > { %1473 = vst.msk [vmem:[#allocation2] sm:$0xff] %vm1472_vm7, %v1470_v32  ;;  %v1464_v34 = vrot.slane %v1451_v30, 7  ;;  %v1454_v35 = vadd.f32 %v3477_v24, %v1453_v33  ;;  %v3646_v36 = vpop.f32.mrb[3].mxu1 }
 0x200   : > { %v1471_v37 = vsel %vm1463_vm6, %v1459_v27, %v1464_v34  ;;  %v1465_v38 = vrot.slane %v1454_v35, 7 }
 0x201   : > { %1474 = vst.msk [vmem:[#allocation2 + $0x8] sm:$0xff] %vm1472_vm7, %v1471_v37 }
 0x202   : > { %v1466_v39 = vsel %vm1463_vm6, %v1464_v34, %v1465_v38  ;;  %1477 = vst.msk [vmem:[#allocation2 + $0x18] sm:$0x1] %vm1476_vm8, %v1465_v38 }
 0x203   : > { %1475 = vst.msk [vmem:[#allocation2 + $0x10] sm:$0xff] %vm1472_vm7, %v1466_v39 }
 0x204 PF: > { %s5420_s15 = sld [smem:[#allocation24_spill]]  ;;  %v4009_v40 = vld [vmem:[%s4891_s7] sm:$0xff]   ;;  %v4010_v41 = vld [vmem:[%s4891_s7 + $0x8] sm:$0xff]   ;;  %vm1541_vm9 = vcmask 261120   ;;  %s5422_s7 = scalar_lea.vmem %s4511_s24, %s4873_s12  ;;  %vm1687_vm10 = vcmask 64512   ;;  %vm1763_vm11 = vcmask 203776  }
 0x205   : > { %3647 = vmatprep.subr.bf16.mxu1 %v4009_v40  ;;  %v1503_v42 = vld [vmem:[#allocation2] sm:$0xff]  ;;  %s4434_s8 = smov 96   ;;  %v4012_v4 = vld [vmem:[%s4894_s28 + $0x8] sm:$0xff]   ;;  %vm1773_vm12 = vcmask 196608   ;;  %vm1809_vm13 = vcmask 1043456   ;;  %vm1810_vm14 = vcmask 1044480  }
 0x206   : > { %3648 = vmatpush3.bf16.msra.mxu1 %v4009_v40  ;;  %v3485_v57 = vld [vmem:[%s5422_s7] ss:$0 sm:$0xff]  ;;  %v4435_v39 = vmov 65535   ;;  %s4437_s0 = smov 120   ;;  %s4438_s17 = smov 80   ;;  %vm2485_vm15 = vcmask 130048  }
 0x207   : > { %3649 = vmatprep.subr.bf16.mxu1 %v4010_v41  ;;  %v4011_v3 = vld [vmem:[%s4894_s28] sm:$0xff]   ;;  %v1811_v40 = vsel %vm1809_vm13, 4294967295, %v4435_v39  ;;  %s4439_s18 = smov 112   ;;  %s4440_s11 = smov 72   ;;  %vm2490_vm0 = vcmask 195584   ;;  %vm2590_vm1 = vcmask 253952  }
 0x208   : > { %v1504_v43 = vld [vmem:[#allocation2 + $0x8] sm:$0xff]  ;;  %v4971_v13 = vld [vmem:[#allocation3] ss:$0 sm:$0xff]  ;;  %s4441_s29 = smov 104   ;;  %s4442_s27 = smov 8   ;;  %vm2780_vm2 = vcmask 523264  }
 0x209   : > { %v1506_v48 = vld [vmem:[#allocation2 + $0x18] sm:$0x1]  ;;  %v1597_v5 = vpack.c.bf16 %v1504_v43, %v1503_v42  ;;  %v3490_v29 = vld [vmem:[%s1257_s20] ss:$0 sm:$0xff]  ;;  %s4436_s20 = smov 88   ;;  %s4443_s22 = smov 16  }
 0x20a   : > { %s5421_s21 = smov %s5420_s15  ;;  %v1507_v44 = vld [vmem:[%s5420_s15] sm:$0xff]  ;;  %v1505_v47 = vld [vmem:[#allocation2 + $0x10] sm:$0xff]  ;;  %3650 = vmatpush3.bf16.msra.mxu1 %v4010_v41  ;;  %v4990_v41 = vsel %vm1810_vm14, %v1811_v40, 0  ;;  %s4444_s25 = smov 24  }
 0x20b   : > { %v1508_v45 = vld [vmem:[%s5421_s21 + $0x8] sm:$0xff]  ;;  %v1512_v46 = vadd.f32 %v1507_v44, %v1503_v42  ;;  %v1509_v50 = vld [vmem:[%s5421_s21 + $0x10] sm:$0xff]  ;;  %v1510_v51 = vld [vmem:[%s5421_s21 + $0x18] sm:$0x1]  ;;  %3655 = vmatprep.subr.bf16.mxu1 %v4011_v3  ;;  %v1598_v6 = vpack.c.bf16 %v1506_v48, %v1505_v47  ;;  %s5432_s12 = sld [smem:[#allocation52_spill]] }
 0x20c   : > { %v1513_v49 = vadd.f32 %v1508_v45, %v1504_v43  ;;  %v1514_v52 = vadd.f32 %v1509_v50, %v1505_v47  ;;  %v1515_v53 = vadd.f32 %v1510_v51, %v1506_v48 }
 0x20e   : > { %v1516_v54 = vpack.c.bf16 %v1513_v49, %v1512_v46  ;;  %v1517_v55 = vpack.c.bf16 %v1515_v53, %v1514_v52 }
 0x210   : > { %3651 = vmatprep.mubr.msk.bf16.mxu1 %vm1541_vm9, %v1516_v54 }
 0x211   : > { %3652 = vmatmul.mubr.msk.bf16.vlgmr.msra.gmra.mrb[0].mxu1 %vm1541_vm9, %v1517_v55  ;;  %p3533_p2 = scmp.ne.s32.totalorder %s5432_s12, 1 }
 0x212   : > { %3659 = vmatprep.mubr.msk.bf16.mxu1 %vm1541_vm9, %v1597_v5  ;;  %3656 = vmatpush3.bf16.msra.mxu1 %v4011_v3  ;;  %s5435_s15 = sld [smem:[#allocation45_spill]] (!%p3533_p2)  ;;  %vm4446_vm3 = vmmov (!%p3533_p2), 0   ;;  %vm3113_vm4 = vcmask (!%p3533_p2), 24576  }
 0x213   : > { %3657 = vmatprep.subr.bf16.mxu1 %v4012_v4 }
 0x216   : > { %3658 = vmatpush3.bf16.msra.mxu1 %v4012_v4 }
 0x219   : > { %3660 = vmatmul.mubr.msk.bf16.vlgmr.msra.gmra.mrb[4].mxu1 %vm1541_vm9, %v1598_v6 }
 0x2e4   : > { %v3653_v56 = vpop.f32.mrb[0].mxu1 }
 0x2e5   : > { %v1582_v58 = vpop.f32.mrb[1].mxu1  ;;  %v1591_v60 = vadd.f32 %v3653_v56, %v3485_v57 }
 0x2e6   : > { %v3654_v59 = vpop.f32.mrb[2].mxu1  ;;  %v1583_v63 = vadd.f32 %v3485_v57, %v1582_v58 }
 0x2e7   : > { %v1594_v61 = vadd.f32 %v3654_v59, %v3485_v57  ;;  %v1585_v62 = vpop.f32.mrb[3].mxu1 }
 0x2e8   : > { %v1586_v0 = vadd.f32 %v3485_v57, %v1585_v62 }
 0x2e9   : > { %v4953_v1 = vpack.c.bf16 %v1594_v61, %v1591_v60 }
 0x2ea   : > { %v4955_v2 = vpack.c.bf16 %v1586_v0, %v1583_v63 }
 0x2ec   : > { %1683 = vrot.lane.b32.xlu0 %v4955_v2, %s4434_s8  ;;  %3667 = vmatprep.mubr.msk.bf16.mxu0 %vm1687_vm10, %v4955_v2  ;;  %v3661_v11 = vpop.f32.mrb[4].mxu1 }
 0x2ed   : > { %v1662_v30 = vpop.f32.mrb[5].mxu1  ;;  %v1671_v33 = vadd.f32 %v3661_v11, %v3490_v29 }
 0x2ee   : > { %v3662_v31 = vpop.f32.mrb[6].mxu1  ;;  %v1663_v34 = vadd.f32 %v3490_v29, %v1662_v30 }
 0x2ef   : > { %v1665_v32 = vpop.f32.mrb[7].mxu1  ;;  %v1674_v36 = vadd.f32 %v3662_v31, %v3490_v29 }
 0x2f0   : > { %1685 = vrot.lane.b32.xlu0 %v4953_v1, %s4434_s8  ;;  %v1666_v35 = vadd.f32 %v3490_v29, %v1665_v32  ;;  %s5436_s8 = smov (!%p3533_p2), %s5435_s15 }
 0x2f1   : > { %v4986_v38 = vpack.c.bf16 %v1674_v36, %v1671_v33 }
 0x2f2   : > { %v4984_v37 = vpack.c.bf16 %v1666_v35, %v1663_v34 }
 0x2f3   : > { %v1814_v42 = vand.u32 %v4990_v41, %v4986_v38 }
 0x2f4   : > { %3671 = vmatprep.subr.bf16.mxu1 %v4984_v37 }
 0x2f5   : > { %3672 = vmatpush3.bf16.msra.mxu1 %v4984_v37 }
 0x2f6   : > { %3673 = vmatprep.subr.bf16.mxu1 %v1814_v42 }
 0x2f9   : > { %3674 = vmatpush3.bf16.msra.mxu1 %v1814_v42 }
 0x35e   : > { %v1684_v7 = vpop.permute.xlu0 %1683 }
 0x35f   : > { %3779 = vmatprep.subr.msk.bf16.mxu0 %vm1687_vm10, %v1684_v7  ;;  %v1695_v8 = vsel %vm1687_vm10, %v1684_v7, 0 }
 0x360   : > { %3664 = vmatpush3.bf16.xpose.msra.mxu0 %v1695_v8 }
 0x362   : > { %v1686_v9 = vpop.permute.xlu0 %1685 }
 0x363   : > { %3780 = vmatprep.subr.msk.bf16.mxu0 %vm1687_vm10, %v1686_v9  ;;  %v1698_v10 = vsel %vm1687_vm10, %v1686_v9, 0 }
 0x368   : > { %3666 = vmatpush3.bf16.xpose.msra.mxu0 %v1698_v10 }
 0x36f   : > { %3668 = vmatmul.mubr.msk.bf16.vlgmr.msra.gmra.mrb[0].mxu0 %vm1687_vm10, %v4953_v1 }
 0x442   : > { %v3669_v12 = vpop.f32.mrb[0].mxu0 }
 0x443   : > { %v1751_v14 = vmul.f32 0.35355338, %v3669_v12  ;;  %v1734_v15 = vpop.f32.mrb[1].mxu0 }
 0x444   : > { %v1749_v16 = vmul.f32 0.35355338, %v1734_v15  ;;  %v3670_v17 = vpop.f32.mrb[2].mxu0 }
 0x445   : > { %v1752_v18 = vmul.f32 0.35355338, %v3670_v17  ;;  %v1737_v19 = vpop.f32.mrb[3].mxu0  ;;  %v1761_v20 = vadd.f32 %v4971_v13, %v1751_v14 }
 0x446   : > { %v1759_v21 = vadd.f32 %v4971_v13, %v1749_v16  ;;  %v1750_v23 = vmul.f32 0.35355338, %v1737_v19 }
 0x447   : > { %v1770_v22 = vsel %vm1763_vm11, %v1761_v20, -inf  ;;  %v1762_v25 = vadd.f32 %v4971_v13, %v1752_v18 }
 0x448   : > { %1771 = vmax.xlane.f32.xlu0 %v1770_v22  ;;  %v1764_v24 = vsel %vm1763_vm11, %v1759_v21, -inf  ;;  %v1760_v27 = vadd.f32 %v4971_v13, %v1750_v23 }
 0x449   : > { %1765 = vmax.xlane.f32.xlu1 %v1764_v24  ;;  %v1774_v26 = vsel %vm1773_vm12, %v1762_v25, -inf }
 0x44a   : > { %v1767_v28 = vsel %vm1763_vm11, %v1760_v27, -inf }
 0x44d   : > { %1775 = vmax.xlane.f32.xlu1 %v1774_v26 }
 0x451   : > { %1768 = vmax.xlane.f32.xlu1 %v1767_v28 }
 0x462   : > { %1877 = vrot.lane.b32.xlu1 %v4955_v2, %s4436_s20 }
 0x466   : > { %1879 = vrot.lane.b32.xlu1 %v4953_v1, %s4436_s20 }
 0x46a   : > { %1873 = vrot.lane.b32.xlu1 %v4955_v2, %s4437_s0 }
 0x46e   : > { %1875 = vrot.lane.b32.xlu1 %v4953_v1, %s4437_s0 }
 0x4d5   : > { %v1772_v44 = vpop.xlane.xlu0 %1771 }
 0x4d6   : > { %v1766_v43 = vpop.xlane.xlu1 %1765  ;;  %v1779_v48 = vsub.f32 %v1761_v20, %v1772_v44 }
 0x4d7   : > { %v1777_v45 = vsub.f32 %v1759_v21, %v1766_v43 }
 0x4d8   : > { %v1785_v53 = vmul.f32 1.442695, %v1779_v48 }
 0x4d9   : > { %v1781_v49 = vmul.f32 1.442695, %v1777_v45 }
 0x4da   : > { %v1776_v46 = vpop.xlane.xlu1 %1775 }
 0x4db   : > { %v1780_v47 = vsub.f32 %v1762_v25, %v1776_v46  ;;  %4021 = vpow2.f32 %v1781_v49 }
 0x4dd   : > { %v1787_v50 = vmul.f32 1.442695, %v1780_v47 }
 0x4de   : > { %v1769_v51 = vpop.xlane.xlu1 %1768 }
 0x4df   : > { %v1778_v52 = vsub.f32 %v1760_v27, %v1769_v51  ;;  %4023 = vpow2.f32 %v1787_v50 }
 0x4e1   : > { %v1783_v54 = vmul.f32 1.442695, %v1778_v52 }
 0x4e2   : > { %v1878_v55 = vpop.permute.xlu1 %1877 }
 0x4e3   : > { %4025 = vpow2.f32 %v1783_v54  ;;  %3781 = vmatprep.subr.msk.bf16.mxu1 %vm1687_vm10, %v1878_v55  ;;  %v1888_v63 = vsel %vm1687_vm10, %v1878_v55, 0 }
 0x4e4   : > { %4027 = vpow2.f32 %v1785_v53 }
 0x4e5   : > { %v5001_v56 = vpop.eup %4021 }
 0x4e6   : > { %v1880_v57 = vpop.permute.xlu1 %1879 }
 0x4e7   : > { %v1891_v3 = vsel %vm1687_vm10, %v1880_v57, 0 }
 0x4e9   : > { %v5003_v58 = vpop.eup %4023 }
 0x4ea   : > { %v1874_v0 = vpop.permute.xlu1 %1873 }
 0x4ed   : > { %v5005_v59 = vpop.eup %4025 }
 0x4ee   : > { %v5007_v60 = vpop.eup %4027  ;;  %v1801_v61 = vpack.c.bf16 %v5005_v59, %v5001_v56  ;;  %v1876_v4 = vpop.permute.xlu1 %1875 }
 0x4ef   : > { %v1802_v62 = vpack.c.bf16 %v5003_v58, %v5007_v60 }
 0x4f0   : > { %3675 = vmatprep.mubr.msk.bf16.mxu1 %vm1763_vm11, %v1801_v61 }
 0x4f1   : > { %3676 = vmatmul.mubr.msk.bf16.vlgmr.msra.gmra.mrb[8].mxu1 %vm1763_vm11, %v1802_v62 }
 0x4f2   : > { %3680 = vmatpush3.bf16.xpose.msra.mxu1 %v1888_v63  ;;  %3683 = vmatprep.mubr.msk.bf16.mxu1 %vm1687_vm10, %v1874_v0 }
 0x4f3   : > { %3782 = vmatprep.subr.msk.bf16.mxu1 %vm1687_vm10, %v1880_v57 }
 0x4fa   : > { %3682 = vmatpush3.bf16.xpose.msra.mxu1 %v1891_v3 }
 0x501   : > { %3684 = vmatmul.mubr.msk.bf16.vlgmr.msra.gmra.mrb[12].mxu1 %vm1687_vm10, %v1876_v4 }
 0x5c4   : > { %v5020_v5 = vpop.f32.mrb[8].mxu1 }
 0x5c5   : > { %v5022_v6 = vpop.f32.mrb[9].mxu1 }
 0x5c6   : > { %v5024_v7 = vpop.f32.mrb[10].mxu1 }
 0x5c7   : > { %v5026_v8 = vpop.f32.mrb[11].mxu1 }
 0x5d4   : > { %v3685_v9 = vpop.f32.mrb[12].mxu1 }
 0x5d5   : > { %v1927_v10 = vpop.f32.mrb[13].mxu1  ;;  %v1944_v11 = vmul.f32 0.35355338, %v3685_v9 }
 0x5d6   : > { %v1942_v12 = vmul.f32 0.35355338, %v1927_v10  ;;  %v3686_v14 = vpop.f32.mrb[14].mxu1 }
 0x5d7   : > { %v1930_v15 = vpop.f32.mrb[15].mxu1  ;;  %v1945_v18 = vmul.f32 0.35355338, %v3686_v14  ;;  %v1948_v21 = vadd.f32 %v4971_v13, %v1944_v11 }
 0x5d8   : > { %v1943_v16 = vmul.f32 0.35355338, %v1930_v15  ;;  %v1946_v17 = vadd.f32 %v4971_v13, %v1942_v12 }
 0x5d9   : > { %v1956_v23 = vsel %vm1763_vm11, %v1948_v21, -inf  ;;  %v1949_v24 = vadd.f32 %v4971_v13, %v1945_v18 }
 0x5da   : > { %v1950_v19 = vsel %vm1763_vm11, %v1946_v17, -inf  ;;  %v1947_v20 = vadd.f32 %v4971_v13, %v1943_v16 }
 0x5db   : > { %1951 = vmax.xlane.f32.xlu0 %v1950_v19  ;;  %v1959_v25 = vsel %vm1773_vm12, %v1949_v24, -inf }
 0x5dc   : > { %v1953_v22 = vsel %vm1763_vm11, %v1947_v20, -inf }
 0x5dd   : > { %1954 = vmax.xlane.f32.xlu1 %v1953_v22 }
 0x5df   : > { %1957 = vmax.xlane.f32.xlu0 %v1956_v23 }
 0x5e3   : > { %1960 = vmax.xlane.f32.xlu0 %v1959_v25 }
 0x5ee   : > { %2067 = vrot.lane.b32.xlu1 %v4953_v1, %s4438_s17 }
 0x5f2   : > { %2178 = vrot.lane.b32.xlu1 %v4986_v38, %s4439_s18 }
 0x5f9   : > { %1990 = vrot.lane.b32.xlu0 %v4984_v37, %s4437_s0 }
 0x5fd   : > { %1992 = vrot.lane.b32.xlu0 %v4986_v38, %s4437_s0 }
 0x601   : > { %2065 = vrot.lane.b32.xlu0 %v4955_v2, %s4438_s17 }
 0x605   : > { %2061 = vrot.lane.b32.xlu0 %v4955_v2, %s4439_s18 }
 0x609   : > { %2063 = vrot.lane.b32.xlu0 %v4953_v1, %s4439_s18 }
 0x668   : > { %v1952_v26 = vpop.xlane.xlu0 %1951 }
 0x669   : > { %v1962_v27 = vsub.f32 %v1946_v17, %v1952_v26 }
 0x66a   : > { %v1955_v28 = vpop.xlane.xlu1 %1954 }
 0x66b   : > { %v1966_v29 = vmul.f32 1.442695, %v1962_v27  ;;  %v1963_v30 = vsub.f32 %v1947_v20, %v1955_v28 }
 0x66c   : > { %v1958_v31 = vpop.xlane.xlu0 %1957 }
 0x66d   : > { %v1968_v32 = vmul.f32 1.442695, %v1963_v30  ;;  %v1964_v33 = vsub.f32 %v1948_v21, %v1958_v31  ;;  %4029 = vpow2.f32 %v1966_v29 }
 0x66e   : > { %v2068_v53 = vpop.permute.xlu1 %2067 }
 0x66f   : > { %4031 = vpow2.f32 %v1968_v32  ;;  %v1970_v34 = vmul.f32 1.442695, %v1964_v33  ;;  %v2079_v54 = vsel %vm1687_vm10, %v2068_v53, 0 }
 0x670   : > { %v1961_v35 = vpop.xlane.xlu0 %1960 }
 0x671   : > { %v1965_v36 = vsub.f32 %v1949_v24, %v1961_v35  ;;  %4033 = vpow2.f32 %v1970_v34 }
 0x672   : > { %v2179_v23 = vpop.permute.xlu1 %2178 }
 0x673   : > { %v1972_v39 = vmul.f32 1.442695, %v1965_v36  ;;  %v2188_v36 = vand.u32 %v2179_v23, %v4990_v41 }
 0x674   : > { %v1991_v40 = vpop.permute.xlu0 %1990 }
 0x675   : > { %4035 = vpow2.f32 %v1972_v39  ;;  %3687 = vmatprep.subr.bf16.mxu0 %v1991_v40 }
 0x676   : > { %3688 = vmatpush3.bf16.msra.mxu0 %v1991_v40 }
 0x677   : > { %v5048_v42 = vpop.eup %4029 }
 0x678   : > { %v1993_v43 = vpop.permute.xlu0 %1992 }
 0x679   : > { %v5050_v44 = vpop.eup %4031  ;;  %v2002_v45 = vand.u32 %v1993_v43, %v4990_v41 }
 0x67a   : > { %v1986_v46 = vpack.c.bf16 %v5050_v44, %v5048_v42 }
 0x67b   : > { %3689 = vmatprep.subr.bf16.mxu0 %v2002_v45  ;;  %v5057_v48 = vpop.eup %4033 }
 0x67c   : > { %3690 = vmatpush3.bf16.msra.mxu0 %v2002_v45  ;;  %v2066_v47 = vpop.permute.xlu0 %2065  ;;  %3691 = vmatprep.mubr.msk.bf16.mxu0 %vm1763_vm11, %v1986_v46 }
 0x67d   : > { %3783 = vmatprep.subr.msk.bf16.mxu0 %vm1687_vm10, %v2066_v47  ;;  %v2076_v52 = vsel %vm1687_vm10, %v2066_v47, 0 }
 0x67f   : > { %v5059_v49 = vpop.eup %4035 }
 0x680   : > { %v1987_v50 = vpack.c.bf16 %v5059_v49, %v5057_v48  ;;  %v2062_v51 = vpop.permute.xlu0 %2061 }
 0x682   : > { %3692 = vmatmul.mubr.msk.bf16.vlgmr.msra.gmra.mrb[4].mxu0 %vm1763_vm11, %v1987_v50 }
 0x683   : > { %3699 = vmatprep.mubr.msk.bf16.mxu0 %vm1687_vm10, %v2062_v51 }
 0x684   : > { %v2064_v55 = vpop.permute.xlu0 %2063 }
 0x685   : > { %3696 = vmatpush3.bf16.xpose.msra.mxu0 %v2076_v52 }
 0x686   : > { %3784 = vmatprep.subr.msk.bf16.mxu0 %vm1687_vm10, %v2068_v53 }
 0x68d   : > { %3698 = vmatpush3.bf16.xpose.msra.mxu0 %v2079_v54 }
 0x694   : > { %3700 = vmatmul.mubr.msk.bf16.vlgmr.msra.gmra.mrb[8].mxu0 %vm1687_vm10, %v2064_v55 }
 0x755   : > { %v5069_v57 = vpop.f32.mrb[4].mxu0 }
 0x756   : > { %v5071_v61 = vpop.f32.mrb[5].mxu0 }
 0x757   : > { %v5073_v62 = vpop.f32.mrb[6].mxu0 }
 0x758   : > { %v5075_v63 = vpop.f32.mrb[7].mxu0 }
 0x767   : > { %v3701_v0 = vpop.f32.mrb[8].mxu0 }
 0x768   : > { %v2132_v3 = vmul.f32 0.35355338, %v3701_v0  ;;  %v2115_v4 = vpop.f32.mrb[9].mxu0 }
 0x769   : > { %v2130_v9 = vmul.f32 0.35355338, %v2115_v4  ;;  %v3702_v10 = vpop.f32.mrb[10].mxu0 }
 0x76a   : > { %v2118_v11 = vpop.f32.mrb[11].mxu0  ;;  %v2136_v12 = vadd.f32 %v4971_v13, %v2132_v3  ;;  %v2133_v15 = vmul.f32 0.35355338, %v3702_v10 }
 0x76b   : > { %v2131_v14 = vmul.f32 0.35355338, %v2118_v11  ;;  %v2134_v17 = vadd.f32 %v4971_v13, %v2130_v9 }
 0x76c   : > { %v2144_v16 = vsel %vm1763_vm11, %v2136_v12, -inf  ;;  %v2137_v21 = vadd.f32 %v4971_v13, %v2133_v15 }
 0x76d   : > { %2145 = vmax.xlane.f32.xlu0 %v2144_v16  ;;  %v2135_v18 = vadd.f32 %v4971_v13, %v2131_v14  ;;  %v2138_v20 = vsel %vm1763_vm11, %v2134_v17, -inf }
 0x76e   : > { %v2147_v22 = vsel %vm1773_vm12, %v2137_v21, -inf }
 0x76f   : > { %v2141_v19 = vsel %vm1763_vm11, %v2135_v18, -inf }
 0x770   : > { %2142 = vmax.xlane.f32.xlu1 %v2141_v19 }
 0x771   : > { %2139 = vmax.xlane.f32.xlu0 %v2138_v20 }
 0x775   : > { %2148 = vmax.xlane.f32.xlu0 %v2147_v22 }
 0x781   : > { %2251 = vrot.lane.b32.xlu1 %v4955_v2, %s4440_s11 }
 0x785   : > { %2247 = vrot.lane.b32.xlu1 %v4955_v2, %s4441_s29 }
 0x78b   : > { %2176 = vrot.lane.b32.xlu0 %v4984_v37, %s4439_s18 }
 0x78f   : > { %2253 = vrot.lane.b32.xlu0 %v4953_v1, %s4440_s11 }
 0x793   : > { %2249 = vrot.lane.b32.xlu0 %v4953_v1, %s4441_s29 }
 0x7fa   : > { %v2146_v24 = vpop.xlane.xlu0 %2145 }
 0x7fb   : > { %v2152_v26 = vsub.f32 %v2136_v12, %v2146_v24 }
 0x7fd   : > { %v2143_v25 = vpop.xlane.xlu1 %2142  ;;  %v2158_v32 = vmul.f32 1.442695, %v2152_v26  ;;  %v1977_v26 = vsel %vm1763_vm11, %v5050_v44, 0.0 }
 0x7fe   : > { %v2151_v27 = vsub.f32 %v2135_v18, %v2143_v25  ;;  %v2140_v28 = vpop.xlane.xlu0 %2139 }
 0x7ff   : > { %v2150_v29 = vsub.f32 %v2134_v17, %v2140_v28  ;;  %v1983_v28 = vsel %vm1773_vm12, %v5059_v49, 0.0 }
 0x800   : > { %v2156_v30 = vmul.f32 1.442695, %v2151_v27  ;;  %v1980_v27 = vsel %vm1763_vm11, %v5057_v48, 0.0 }
 0x801   : > { %v2154_v31 = vmul.f32 1.442695, %v2150_v29  ;;  %v2252_v39 = vpop.permute.xlu1 %2251 }
 0x802   : > { %4037 = vpow2.f32 %v2156_v30  ;;  %v2149_v2 = vpop.xlane.xlu0 %2148  ;;  %v2262_v50 = vsel %vm1687_vm10, %v2252_v39, 0 }
 0x803   : > { %4039 = vpow2.f32 %v2154_v31  ;;  %v2153_v33 = vsub.f32 %v2137_v21, %v2149_v2 }
 0x804   : > { %4041 = vpow2.f32 %v2158_v32 }
 0x805   : > { %v2160_v34 = vmul.f32 1.442695, %v2153_v33  ;;  %v2248_v51 = vpop.permute.xlu1 %2247 }
 0x806   : > { %v2177_v35 = vpop.permute.xlu0 %2176 }
 0x807   : > { %4043 = vpow2.f32 %v2160_v34  ;;  %3703 = vmatprep.subr.bf16.mxu1 %v2177_v35 }
 0x808   : > { %3704 = vmatpush3.bf16.msra.mxu1 %v2177_v35 }
 0x809   : > { %3705 = vmatprep.subr.bf16.mxu1 %v2188_v36 }
 0x80a   : > { %v2254_v52 = vpop.permute.xlu0 %2253 }
 0x80b   : > { %v2265_v53 = vsel %vm1687_vm10, %v2254_v52, 0 }
 0x80c   : > { %v4038_v1 = vpop.eup %4037  ;;  %3706 = vmatpush3.bf16.msra.mxu1 %v2188_v36 }
 0x80d   : > { %v4040_v40 = vpop.eup %4039  ;;  %3785 = vmatprep.subr.msk.bf16.mxu1 %vm1687_vm10, %v2252_v39 }
 0x80e   : > { %v2174_v43 = vpack.c.bf16 %v4038_v1, %v4040_v40  ;;  %v4042_v45 = vpop.eup %4041  ;;  %v2250_v54 = vpop.permute.xlu0 %2249 }
 0x80f   : > { %v2168_v44 = vsel %vm1763_vm11, %v4042_v45, 0.0 }
 0x810   : > { %3707 = vmatprep.mubr.msk.bf16.mxu1 %vm1763_vm11, %v2174_v43 }
 0x811   : > { %v4044_v46 = vpop.eup %4043 }
 0x812   : > { %v2175_v47 = vpack.c.bf16 %v4044_v46, %v4042_v45 }
 0x814   : > { %3708 = vmatmul.mubr.msk.bf16.vlgmr.msra.gmra.mrb[16].mxu1 %vm1763_vm11, %v2175_v47 }
 0x815   : > { %3712 = vmatpush3.bf16.xpose.msra.mxu1 %v2262_v50  ;;  %3715 = vmatprep.mubr.msk.bf16.mxu1 %vm1687_vm10, %v2248_v51 }
 0x816   : > { %3786 = vmatprep.subr.msk.bf16.mxu1 %vm1687_vm10, %v2254_v52 }
 0x81d   : > { %3714 = vmatpush3.bf16.xpose.msra.mxu1 %v2265_v53 }
 0x824   : > { %3716 = vmatmul.mubr.msk.bf16.vlgmr.msra.gmra.mrb[20].mxu1 %vm1687_vm10, %v2250_v54 }
 0x8e7   : > { %v5102_v55 = vpop.f32.mrb[16].mxu1 }
 0x8e8   : > { %v5104_v0 = vpop.f32.mrb[17].mxu1 }
 0x8e9   : > { %v5106_v3 = vpop.f32.mrb[18].mxu1 }
 0x8ea   : > { %v5108_v4 = vpop.f32.mrb[19].mxu1 }
 0x8f7   : > { %v3717_v9 = vpop.f32.mrb[20].mxu1 }
 0x8f8   : > { %v2318_v10 = vmul.f32 0.35355338, %v3717_v9  ;;  %v2301_v11 = vpop.f32.mrb[21].mxu1 }
 0x8f9   : > { %v2316_v12 = vmul.f32 0.35355338, %v2301_v11  ;;  %v3718_v14 = vpop.f32.mrb[22].mxu1  ;;  %v1792_v11 = vsel %vm1763_vm11, %v5005_v59, 0.0 }
 0x8fa   : > { %v2319_v15 = vmul.f32 0.35355338, %v3718_v14  ;;  %v2304_v16 = vpop.f32.mrb[23].mxu1  ;;  %v2322_v17 = vadd.f32 %v4971_v13, %v2318_v10  ;;  %v1789_v10 = vsel %vm1763_vm11, %v5001_v56, 0.0  ;;  %v1798_v14 = vsel %vm1773_vm12, %v5003_v58, 0.0 }
 0x8fb   : > { %v2317_v18 = vmul.f32 0.35355338, %v2304_v16  ;;  %v2320_v19 = vadd.f32 %v4971_v13, %v2316_v12  ;;  %v1795_v12 = vsel %vm1763_vm11, %v5007_v60, 0.0 }
 0x8fc   : > { %v2330_v20 = vsel %vm1763_vm11, %v2322_v17, -inf  ;;  %v2323_v23 = vadd.f32 %v4971_v13, %v2319_v15 }
 0x8fd   : > { %2331 = vmax.xlane.f32.xlu0 %v2330_v20  ;;  %v2324_v21 = vsel %vm1763_vm11, %v2320_v19, -inf  ;;  %v2321_v22 = vadd.f32 %v4971_v13, %v2317_v18  ;;  %v1974_v13 = vsel %vm1763_vm11, %v5048_v42, 0.0  ;;  %v2171_v42 = vsel %vm1773_vm12, %v4044_v46, 0.0 }
 0x8fe   : > { %2325 = vmax.xlane.f32.xlu1 %v2324_v21  ;;  %v2333_v25 = vsel %vm1773_vm12, %v2323_v23, -inf }
 0x8ff   : > { %v2327_v24 = vsel %vm1763_vm11, %v2321_v22, -inf }
 0x901   : > { %2328 = vmax.xlane.f32.xlu0 %v2327_v24 }
 0x902   : > { %2334 = vmax.xlane.f32.xlu1 %v2333_v25 }
 0x913   : > { %2364 = vrot.lane.b32.xlu1 %v4986_v38, %s4441_s29  ;;  %v2162_v38 = vsel %vm1763_vm11, %v4040_v40, 0.0 }
 0x917   : > { %2362 = vrot.lane.b32.xlu0 %v4984_v37, %s4441_s29  ;;  %v2165_v37 = vsel %vm1763_vm11, %v4038_v1, 0.0 }
 0x936   : > { %1978 = vadd.xlane.f32.xlu0 %v1977_v26 }
 0x937   : > { %1975 = vadd.xlane.f32.xlu1 %v1974_v13 }
 0x93a   : > { %1981 = vadd.xlane.f32.xlu0 %v1980_v27 }
 0x93b   : > { %1984 = vadd.xlane.f32.xlu1 %v1983_v28 }
 0x93e   : > { %2163 = vadd.xlane.f32.xlu0 %v2162_v38 }
 0x93f   : > { %2166 = vadd.xlane.f32.xlu1 %v2165_v37 }
 0x942   : > { %2169 = vadd.xlane.f32.xlu0 %v2168_v44 }
 0x943   : > { %2172 = vadd.xlane.f32.xlu1 %v2171_v42 }
 0x98a   : > { %v2332_v29 = vpop.xlane.xlu0 %2331 }
 0x98b   : > { %v2338_v30 = vsub.f32 %v2322_v17, %v2332_v29  ;;  %v2326_v48 = vpop.xlane.xlu1 %2325 }
 0x98c   : > { %v2336_v31 = vsub.f32 %v2320_v19, %v2326_v48 }
 0x98d   : > { %v2344_v32 = vmul.f32 1.442695, %v2338_v30  ;;  %v4013_v30 = vld [vmem:[%s4899_s4] sm:$0xff]  }
 0x98e   : > { %v2340_v2 = vmul.f32 1.442695, %v2336_v31  ;;  %v2329_v49 = vpop.xlane.xlu0 %2328 }
 0x98f   : > { %v2337_v33 = vsub.f32 %v2321_v22, %v2329_v49  ;;  %v2335_v34 = vpop.xlane.xlu1 %2334 }
 0x990   : > { %4045 = vpow2.f32 %v2340_v2  ;;  %v2339_v35 = vsub.f32 %v2323_v23, %v2335_v34 }
 0x991   : > { %v2342_v36 = vmul.f32 1.442695, %v2337_v33  ;;  %4047 = vpow2.f32 %v2344_v32 }
 0x992   : > { %v2346_v1 = vmul.f32 1.442695, %v2339_v35  ;;  %v2363_v39 = vpop.permute.xlu0 %2362 }
 0x993   : > { %4049 = vpow2.f32 %v2342_v36  ;;  %v2365_v40 = vpop.permute.xlu1 %2364  ;;  %3719 = vmatprep.subr.bf16.mxu0 %v2363_v39 }
 0x994   : > { %4051 = vpow2.f32 %v2346_v1  ;;  %v2374_v43 = vand.u32 %v2365_v40, %v4990_v41  ;;  %3720 = vmatpush3.bf16.msra.mxu0 %v2363_v39 }
 0x996   : > { %3721 = vmatprep.subr.bf16.mxu0 %v2374_v43 }
 0x998   : > { %3722 = vmatpush3.bf16.msra.mxu0 %v2374_v43 }
 0x999   : > { %3727 = vmatprep.subr.bf16.mxu0 %v4013_v30 }
 0x99a   : > { %v4046_v45 = vpop.eup %4045 }
 0x99b   : > { %v2348_v46 = vsel %vm1763_vm11, %v4046_v45, 0.0  ;;  %v4048_v47 = vpop.eup %4047 }
 0x99c   : > { %2349 = vadd.xlane.f32.xlu0 %v2348_v46  ;;  %v2354_v54 = vsel %vm1763_vm11, %v4048_v47, 0.0 }
 0x99d   : > { %v4050_v50 = vpop.eup %4049 }
 0x99e   : > { %v4052_v51 = vpop.eup %4051  ;;  %v2351_v52 = vsel %vm1763_vm11, %v4050_v50, 0.0  ;;  %v2360_v53 = vpack.c.bf16 %v4050_v50, %v4046_v45 }
 0x99f   : > { %2352 = vadd.xlane.f32.xlu1 %v2351_v52  ;;  %v2361_v9 = vpack.c.bf16 %v4052_v51, %v4048_v47  ;;  %v2357_v41 = vsel %vm1773_vm12, %v4052_v51, 0.0 }
 0x9a0   : > { %2355 = vadd.xlane.f32.xlu0 %v2354_v54  ;;  %3723 = vmatprep.mubr.msk.bf16.mxu0 %vm1763_vm11, %v2360_v53 }
 0x9a1   : > { %3724 = vmatmul.mubr.msk.bf16.vlgmr.msra.gmra.mrb[12].mxu0 %vm1763_vm11, %v2361_v9 }
 0x9a2   : > { %3728 = vmatpush3.bf16.msra.mxu0 %v4013_v30  ;;  %v3512_v30 = vld [vmem:[%s1265_s1] ss:$0 sm:$0xff] }
 0x9a3   : > { %2358 = vadd.xlane.f32.xlu1 %v2357_v41 }
 0x9a4   : > { %1790 = vadd.xlane.f32.xlu0 %v1789_v10 }
 0x9a7   : > { %1793 = vadd.xlane.f32.xlu1 %v1792_v11 }
 0x9a8   : > { %1796 = vadd.xlane.f32.xlu0 %v1795_v12 }
 0x9ab   : > { %1799 = vadd.xlane.f32.xlu1 %v1798_v14 }
 0x9c3   : > { %v1979_v15 = vpop.xlane.xlu0 %1978 }
 0x9c4   : > { %4053 = vrcp.f32 %v1979_v15  ;;  %v1976_v16 = vpop.xlane.xlu1 %1975 }
 0x9c5   : > { %4055 = vrcp.f32 %v1976_v16 }
 0x9c7   : > { %v1982_v17 = vpop.xlane.xlu0 %1981 }
 0x9c8   : > { %4057 = vrcp.f32 %v1982_v17  ;;  %v1985_v56 = vpop.xlane.xlu1 %1984 }
 0x9c9   : > { %4059 = vrcp.f32 %v1985_v56 }
 0x9cb   : > { %v2164_v18 = vpop.xlane.xlu0 %2163 }
 0x9cc   : > { %4061 = vrcp.f32 %v2164_v18  ;;  %v2167_v59 = vpop.xlane.xlu1 %2166 }
 0x9cd   : > { %4063 = vrcp.f32 %v2167_v59 }
 0x9ce   : > { %v4054_v19 = vpop.eup %4053 }
 0x9cf   : > { %v4056_v20 = vpop.eup %4055  ;;  %v2170_v60 = vpop.xlane.xlu0 %2169  ;;  %v2056_v21 = vmul.f32 %v4054_v19, %v5075_v63 }
 0x9d0   : > { %4065 = vrcp.f32 %v2170_v60  ;;  %v2173_v58 = vpop.xlane.xlu1 %2172  ;;  %v2054_v22 = vmul.f32 %v4056_v20, %v5071_v61 }
 0x9d1   : > { %4067 = vrcp.f32 %v2173_v58 }
 0x9d2   : > { %v4058_v23 = vpop.eup %4057  ;;  %v3979_v24 = vpack.i.bf16 %v2056_v21, %v2054_v22 }
 0x9d3   : > { %v4060_v25 = vpop.eup %4059  ;;  %v2058_v26 = vmul.f32 %v4058_v23, %v5069_v57 }
 0x9d4   : > { %3980 = vrot.lane.b32.xlu0 %v3979_v24, %s4442_s27  ;;  %v2060_v13 = vmul.f32 %v4060_v25, %v5073_v62 }
 0x9d6   : > { %v4062_v27 = vpop.eup %4061  ;;  %v3984_v28 = vpack.i.bf16 %v2060_v13, %v2058_v26 }
 0x9d7   : > { %v4064_v38 = vpop.eup %4063  ;;  %v2240_v63 = vmul.f32 %v4062_v27, %v5104_v0 }
 0x9d8   : > { %3985 = vrot.lane.b32.xlu1 %v3984_v28, %s4442_s27  ;;  %v2242_v37 = vmul.f32 %v4064_v38, %v5108_v4  ;;  %v4014_v4 = vld [vmem:[%s4899_s4 + $0x8] sm:$0xff]  }
 0x9d9   : > { %3729 = vmatprep.subr.bf16.mxu0 %v4014_v4 }
 0x9da   : > { %v4066_v61 = vpop.eup %4065  ;;  %v3989_v44 = vpack.i.bf16 %v2242_v37, %v2240_v63  ;;  %3730 = vmatpush3.bf16.msra.mxu0 %v4014_v4 }
 0x9db   : > { %v4068_v42 = vpop.eup %4067  ;;  %v2244_v29 = vmul.f32 %v4066_v61, %v5102_v55 }
 0x9dc   : > { %3990 = vrot.lane.b32.xlu1 %v3989_v44, %s4443_s22  ;;  %v2246_v57 = vmul.f32 %v4068_v42, %v5106_v3 }
 0x9de   : > { %v3994_v62 = vpack.i.bf16 %v2246_v57, %v2244_v29 }
 0x9e0   : > { %3995 = vrot.lane.b32.xlu0 %v3994_v62, %s4443_s22 }
 0xa29   : > { %v2350_v48 = vpop.xlane.xlu0 %2349 }
 0xa2a   : > { %4069 = vrcp.f32 %v2350_v48 }
 0xa2c   : > { %v2353_v0 = vpop.xlane.xlu1 %2352 }
 0xa2d   : > { %v2356_v31 = vpop.xlane.xlu0 %2355 }
 0xa2e   : > { %4071 = vrcp.f32 %v2356_v31 }
 0xa30   : > { %v2359_v32 = vpop.xlane.xlu1 %2358 }
 0xa31   : > { %4073 = vrcp.f32 %v2359_v32  ;;  %v1791_v47 = vpop.xlane.xlu0 %1790 }
 0xa32   : > { %4075 = vrcp.f32 %v2353_v0 }
 0xa33   : > { %4077 = vrcp.f32 %v1791_v47 }
 0xa34   : > { %v4070_v55 = vpop.eup %4069  ;;  %v1794_v50 = vpop.xlane.xlu1 %1793 }
 0xa35   : > { %v1797_v51 = vpop.xlane.xlu0 %1796  ;;  %4079 = vrcp.f32 %v1794_v50 }
 0xa36   : > { %4081 = vrcp.f32 %v1797_v51 }
 0xa38   : > { %v4072_v49 = vpop.eup %4071  ;;  %v1800_v52 = vpop.xlane.xlu1 %1799 }
 0xa39   : > { %4083 = vrcp.f32 %v1800_v52 }
 0xa3b   : > { %v4074_v33 = vpop.eup %4073 }
 0xa3c   : > { %v4076_v35 = vpop.eup %4075 }
 0xa3d   : > { %v4078_v9 = vpop.eup %4077 }
 0xa3e   : > { %v1866_v18 = vmul.f32 %v4078_v9, %v5022_v6 }
 0xa3f   : > { %v4080_v41 = vpop.eup %4079 }
 0xa40   : > { %v4082_v10 = vpop.eup %4081  ;;  %v1868_v59 = vmul.f32 %v4080_v41, %v5026_v8 }
 0xa41   : > { %v1870_v21 = vmul.f32 %v4082_v10, %v5020_v5 }
 0xa43   : > { %v4084_v12 = vpop.eup %4083 }
 0xa44   : > { %v1872_v60 = vmul.f32 %v4084_v12, %v5024_v7 }
 0xa46   : > { %v3981_v54 = vpop.permute.xlu0 %3980 }
 0xa47   : > { %v3983_v14 = vunpack.i.h.bf16 %v3981_v54  ;;  %v3982_v15 = vunpack.i.l.bf16 %v3981_v54 }
 0xa49   : > { %v2482_v23 = vsel %vm1687_vm10, %v1868_v59, %v3983_v14  ;;  %v2481_v24 = vsel %vm1687_vm10, %v1866_v18, %v3982_v15 }
 0xa4a   : > { %v3986_v53 = vpop.permute.xlu1 %3985 }
 0xa4b   : > { %v3988_v17 = vunpack.i.h.bf16 %v3986_v53  ;;  %v3987_v56 = vunpack.i.l.bf16 %v3986_v53 }
 0xa4d   : > { %v2484_v26 = vsel %vm1687_vm10, %v1872_v60, %v3988_v17  ;;  %v2483_v6 = vsel %vm1687_vm10, %v1870_v21, %v3987_v56  ;;  %v4015_v21 = vld [vmem:[%s4908_s2] sm:$0xff]  }
 0xa4e   : > { %v3991_v16 = vpop.permute.xlu1 %3990  ;;  %3735 = vmatprep.subr.bf16.mxu1 %v4015_v21 }
 0xa4f   : > { %v3993_v58 = vunpack.i.h.bf16 %v3991_v16  ;;  %v3992_v22 = vunpack.i.l.bf16 %v3991_v16  ;;  %3736 = vmatpush3.bf16.msra.mxu1 %v4015_v21 }
 0xa51   : > { %v2486_v63 = vsel %vm2485_vm15, %v2481_v24, %v3992_v22  ;;  %v2487_v37 = vsel %vm2485_vm15, %v2482_v23, %v3993_v58  ;;  %v4016_v58 = vld [vmem:[%s4908_s2 + $0x8] sm:$0xff]   ;;  %v4017_v22 = vld [vmem:[%s4914_s13] sm:$0xff]   ;;  %s5427_s2 = sld [smem:[#allocation63_spill]] }
 0xa52   : > { %v3996_v11 = vpop.permute.xlu0 %3995  ;;  %3737 = vmatprep.subr.bf16.mxu1 %v4016_v58  ;;  %v4018_v23 = vld [vmem:[%s4914_s13 + $0x8] sm:$0xff]   ;;  %3743 = vmatprep.subr.bf16.mxu0 %v4017_v22 }
 0xa53   : > { %v3998_v19 = vunpack.i.h.bf16 %v3996_v11  ;;  %v3997_v20 = vunpack.i.l.bf16 %v3996_v11  ;;  %3738 = vmatpush3.bf16.msra.mxu1 %v4016_v58 }
 0xa55   : > { %v2489_v27 = vsel %vm2485_vm15, %v2484_v26, %v3998_v19  ;;  %v2488_v5 = vsel %vm2485_vm15, %v2483_v6, %v3997_v20 }
 0xa74   : > { %v3725_v2 = vpop.f32.mrb[12].mxu0 }
 0xa75   : > { %v2410_v3 = vpop.f32.mrb[13].mxu0  ;;  %v2430_v36 = vmul.f32 %v4072_v49, %v3725_v2 }
 0xa76   : > { %v3726_v34 = vpop.f32.mrb[14].mxu0  ;;  %v2426_v40 = vmul.f32 %v4070_v55, %v2410_v3  ;;  %v4101_v3 = vld [vmem:[#allocation2] sm:$0xff] }
 0xa77   : > { %v2432_v1 = vmul.f32 %v4074_v33, %v3726_v34  ;;  %v2413_v39 = vpop.f32.mrb[15].mxu0 }
 0xa78   : > { %v2428_v43 = vmul.f32 %v4076_v35, %v2413_v39  ;;  %v4102_v35 = vld [vmem:[#allocation2 + $0x8] sm:$0xff] }
 0xa79   : > { %v4004_v45 = vpack.i.bf16 %v2432_v1, %v2430_v36  ;;  %v4103_v1 = vld [vmem:[#allocation2 + $0x18] sm:$0x1] }
 0xa7a   : > { %v3999_v46 = vpack.i.bf16 %v2428_v43, %v2426_v40  ;;  %v4104_v43 = vld [vmem:[#allocation2 + $0x10] sm:$0xff] }
 0xa7b   : > { %4005 = vrot.lane.b32.xlu0 %v4004_v45, %s4444_s25 }
 0xa7c   : > { %4000 = vrot.lane.b32.xlu1 %v3999_v46, %s4444_s25 }
 0xaed   : > { %v4006_v25 = vpop.permute.xlu0 %4005 }
 0xaee   : > { %v4008_v8 = vunpack.i.h.bf16 %v4006_v25  ;;  %v4007_v13 = vunpack.i.l.bf16 %v4006_v25  ;;  %v4001_v7 = vpop.permute.xlu1 %4000 }
 0xaef   : > { %v4003_v28 = vunpack.i.h.bf16 %v4001_v7  ;;  %v4002_v38 = vunpack.i.l.bf16 %v4001_v7 }
 0xaf0   : > { %v2493_v61 = vsel %vm2490_vm0, %v2488_v5, %v4007_v13  ;;  %v2494_v44 = vsel %vm2490_vm0, %v2489_v27, %v4008_v8 }
 0xaf1   : > { %v2496_v42 = vpack.c.bf16 %v2494_v44, %v2493_v61  ;;  %v2491_v29 = vsel %vm2490_vm0, %v2486_v63, %v4002_v38  ;;  %v2492_v57 = vsel %vm2490_vm0, %v2487_v37, %v4003_v28  ;;  %v3517_v61 = vld [vmem:[%s1268_s9] ss:$0 sm:$0xff]  ;;  %s5429_s9 = scalar_lea.vmem [#allocation7], %s5427_s2 }
 0xaf2   : > { %v2495_v62 = vpack.c.bf16 %v2492_v57, %v2491_v29 }
 0xaf4   : > { %3731 = vmatprep.mubr.msk.bf16.mxu0 %vm1541_vm9, %v2495_v62  ;;  %v3518_v62 = vld [vmem:[%s1271_s5] ss:$0 sm:$0xff]  ;;  %s5428_s5 = scalar_lea.vmem [#allocation4], %s5427_s2 }
 0xaf5   : > { %3732 = vmatmul.mubr.msk.bf16.vlgmr.msra.gmra.mrb[16].mxu0 %vm1541_vm9, %v2496_v42 }
 0xaf6   : > { %3744 = vmatpush3.bf16.msra.mxu0 %v4017_v22 }
 0xaf7   : > { %3745 = vmatprep.subr.bf16.mxu0 %v4018_v23 }
 0xafa   : > { %3746 = vmatpush3.bf16.msra.mxu0 %v4018_v23 }
 0xbc8   : > { %v3733_v48 = vpop.f32.mrb[16].mxu0 }
 0xbc9   : > { %v2560_v0 = vpop.f32.mrb[17].mxu0  ;;  %v2569_v2 = vadd.f32 %v3733_v48, %v3512_v30 }
 0xbca   : > { %v2561_v31 = vadd.f32 %v3512_v30, %v2560_v0  ;;  %v3734_v32 = vpop.f32.mrb[18].mxu0 }
 0xbcb   : > { %v2572_v4 = vadd.f32 %v3734_v32, %v3512_v30  ;;  %v2563_v55 = vpop.f32.mrb[19].mxu0  ;;  %v2577_v45 = vadd.f32 %v4104_v43, %v2569_v2 }
 0xbcc   : > { %v2564_v49 = vadd.f32 %v3512_v30, %v2563_v55  ;;  %v2575_v33 = vadd.f32 %v4101_v3, %v2561_v31 }
 0xbcd   : > { %v2578_v39 = vadd.f32 %v4103_v1, %v2572_v4  ;;  %v2587_v47 = vsel %vm1541_vm9, %v2577_v45, 0.0  ;;  %v4020_v1 = vld [vmem:[%s4914_s13 + $0x18] sm:$0xff]  }
 0xbce   : > { %v2581_v34 = vsel %vm1541_vm9, %v2575_v33, 0.0  ;;  %v2576_v36 = vadd.f32 %v4102_v35, %v2564_v49 }
 0xbcf   : > { %2582 = vadd.xlane.f32.xlu1 %v2581_v34  ;;  %v2591_v46 = vsel %vm2590_vm1, %v2578_v39, 0.0 }
 0xbd0   : > { %v2584_v40 = vsel %vm1541_vm9, %v2576_v36, 0.0 }
 0xbd1   : > { %2585 = vadd.xlane.f32.xlu0 %v2584_v40 }
 0xbd3   : > { %2592 = vadd.xlane.f32.xlu1 %v2591_v46 }
 0xbd5   : > { %2588 = vadd.xlane.f32.xlu0 %v2587_v47 }
 0xc5c   : > { %v2583_v50 = vpop.xlane.xlu1 %2582 }
 0xc5d   : > { %v2595_v51 = vmul.f32 0.03125, %v2583_v50 }
 0xc5e   : > { %v2586_v52 = vpop.xlane.xlu0 %2585 }
 0xc5f   : > { %v2599_v53 = vsub.f32 %v2575_v33, %v2595_v51  ;;  %v2596_v54 = vmul.f32 0.03125, %v2586_v52 }
 0xc60   : > { %v2593_v9 = vpop.xlane.xlu1 %2592 }
 0xc61   : > { %v2600_v41 = vsub.f32 %v2576_v36, %v2596_v54  ;;  %v2598_v10 = vmul.f32 0.03125, %v2593_v9  ;;  %v2603_v11 = vmul.f32 %v2599_v53, %v2599_v53  ;;  %v4019_v36 = vld [vmem:[%s4914_s13 + $0x10] sm:$0xff]  }
 0xc62   : > { %v2589_v12 = vpop.xlane.xlu0 %2588  ;;  %3747 = vmatprep.subr.bf16.mxu0 %v4019_v36 }
 0xc63   : > { %v2602_v14 = vsub.f32 %v2578_v39, %v2598_v10  ;;  %v2597_v15 = vmul.f32 0.03125, %v2589_v12  ;;  %v2607_v16 = vsel %vm1541_vm9, %v2603_v11, 0.0  ;;  %v2604_v17 = vmul.f32 %v2600_v41, %v2600_v41  ;;  %3748 = vmatpush3.bf16.msra.mxu0 %v4019_v36  ;;  %v3519_v39 = vld [vmem:[%s5428_s5] ss:$0 sm:$0xff] }
 0xc64   : > { %2608 = vadd.xlane.f32.xlu0 %v2607_v16  ;;  %3749 = vmatprep.subr.bf16.mxu0 %v4020_v1  ;;  %v3524_v12 = vld [vmem:[%s5429_s9] ss:$0 sm:$0xff] }
 0xc65   : > { %v2601_v56 = vsub.f32 %v2577_v45, %v2597_v15  ;;  %v2610_v18 = vsel %vm1541_vm9, %v2604_v17, 0.0  ;;  %v2606_v59 = vmul.f32 %v2602_v14, %v2602_v14 }
 0xc66   : > { %2611 = vadd.xlane.f32.xlu1 %v2610_v18 }
 0xc67   : > { %v2605_v19 = vmul.f32 %v2601_v56, %v2601_v56  ;;  %v2616_v60 = vsel %vm2590_vm1, %v2606_v59, 0.0  ;;  %3750 = vmatpush3.bf16.msra.mxu0 %v4020_v1 }
 0xc69   : > { %v2613_v20 = vsel %vm1541_vm9, %v2605_v19, 0.0 }
 0xc6a   : > { %2614 = vadd.xlane.f32.xlu0 %v2613_v20  ;;  %2617 = vadd.xlane.f32.xlu1 %v2616_v60 }
 0xcf1   : > { %v2609_v24 = vpop.xlane.xlu0 %2608 }
 0xcf2   : > { %v2619_v25 = vmul.f32 0.03125, %v2609_v24 }
 0xcf3   : > { %v2612_v26 = vpop.xlane.xlu1 %2611 }
 0xcf4   : > { %v2623_v6 = vadd.f32 1e-05, %v2619_v25  ;;  %v2620_v8 = vmul.f32 0.03125, %v2612_v26 }
 0xcf6   : > { %4085 = vrsqrt.f32 %v2623_v6  ;;  %v2624_v13 = vadd.f32 1e-05, %v2620_v8 }
 0xcf7   : > { %v2615_v7 = vpop.xlane.xlu0 %2614  ;;  %v2618_v27 = vpop.xlane.xlu1 %2617 }
 0xcf8   : > { %4087 = vrsqrt.f32 %v2624_v13  ;;  %v2621_v5 = vmul.f32 0.03125, %v2615_v7  ;;  %v2622_v28 = vmul.f32 0.03125, %v2618_v27 }
 0xcfa   : > { %v2625_v38 = vadd.f32 1e-05, %v2621_v5  ;;  %v2626_v63 = vadd.f32 1e-05, %v2622_v28 }
 0xcfc   : > { %4089 = vrsqrt.f32 %v2625_v38 }
 0xcfd   : > { %4091 = vrsqrt.f32 %v2626_v63 }
 0xd00   : > { %v4086_v37 = vpop.eup %4085 }
 0xd01   : > { %v2631_v44 = vmul.f32 %v4086_v37, %v2599_v53 }
 0xd02   : > { %v4088_v42 = vpop.eup %4087 }
 0xd03   : > { %v2632_v29 = vmul.f32 %v4088_v42, %v2600_v41  ;;  %v2641_v57 = vmul.f32 %v3517_v61, %v2631_v44 }
 0xd05   : > { %v2642_v30 = vmul.f32 %v3517_v61, %v2632_v29  ;;  %v2651_v32 = vadd.f32 %v3518_v62, %v2641_v57 }
 0xd06   : > { %v4090_v48 = vpop.eup %4089 }
 0xd07   : > { %v4092_v0 = vpop.eup %4091  ;;  %v2633_v31 = vmul.f32 %v4090_v48, %v2601_v56  ;;  %v2652_v4 = vadd.f32 %v3518_v62, %v2642_v30 }
 0xd08   : > { %v2634_v55 = vmul.f32 %v4092_v0, %v2602_v14 }
 0xd09   : > { %v2643_v2 = vmul.f32 %v3517_v61, %v2633_v31  ;;  %v2655_v49 = vpack.c.bf16 %v2652_v4, %v2651_v32 }
 0xd0a   : > { %v2644_v3 = vmul.f32 %v3517_v61, %v2634_v55 }
 0xd0b   : > { %3739 = vmatprep.mubr.msk.bf16.mxu1 %vm1541_vm9, %v2655_v49  ;;  %v2653_v33 = vadd.f32 %v3518_v62, %v2643_v2 }
 0xd0c   : > { %v2654_v34 = vadd.f32 %v3518_v62, %v2644_v3 }
 0xd0e   : > { %v2656_v35 = vpack.c.bf16 %v2654_v34, %v2653_v33 }
 0xd10   : > { %3740 = vmatmul.mubr.msk.bf16.vlgmr.msra.gmra.mrb[24].mxu1 %vm1541_vm9, %v2656_v35 }
 0xde3   : > { %v3741_v40 = vpop.f32.mrb[24].mxu1 }
 0xde4   : > { %v2729_v43 = vadd.f32 %v3741_v40, %v3519_v39  ;;  %v2720_v45 = vpop.f32.mrb[25].mxu1  ;;  %v3531_v40 = vld [vmem:[%s1284_s6] ss:$0 sm:$0xff]  ;;  %s5433_s6 = sld [smem:[#allocation41_spill]] (!%p3533_p2) }
 0xde5   : > { %v2721_v46 = vadd.f32 %v3519_v39, %v2720_v45  ;;  %v3742_v47 = vpop.f32.mrb[26].mxu1 }
 0xde6   : > { %v2732_v50 = vadd.f32 %v3742_v47, %v3519_v39  ;;  %v2723_v51 = vpop.f32.mrb[27].mxu1  ;;  %v2737_v53 = vmax.f32 %v2729_v43, 0.0 }
 0xde7   : > { %v2724_v52 = vadd.f32 %v3519_v39, %v2723_v51  ;;  %v2735_v9 = vmax.f32 %v2721_v46, 0.0  ;;  %v3532_v46 = vld [vmem:[%s1287_s3] ss:$0 sm:$0xff]  ;;  %s5434_s3 = sld [smem:[#allocation43_spill]] (!%p3533_p2) }
 0xde8   : > { %v2738_v54 = vmax.f32 %v2732_v50, 0.0 }
 0xde9   : > { %v2736_v41 = vmax.f32 %v2724_v52, 0.0 }
 0xdea   : > { %v2740_v10 = vpack.c.bf16 %v2738_v54, %v2737_v53 }
 0xdeb   : > { %v2739_v11 = vpack.c.bf16 %v2736_v41, %v2735_v9 }
 0xded   : > { %3751 = vmatprep.mubr.msk.bf16.mxu0 %vm2780_vm2, %v2739_v11 }
 0xdee   : > { %3752 = vmatmul.mubr.msk.bf16.vlgmr.msra.gmra.mrb[20].mxu0 %vm2780_vm2, %v2740_v10 }
 0xec1   : > { %v3753_v14 = vpop.f32.mrb[20].mxu0 }
 0xec2   : > { %v2821_v15 = vpop.f32.mrb[21].mxu0  ;;  %v2830_v16 = vadd.f32 %v3753_v14, %v3524_v12 }
 0xec3   : > { %v2822_v17 = vadd.f32 %v3524_v12, %v2821_v15  ;;  %v3754_v56 = vpop.f32.mrb[22].mxu0 }
 0xec4   : > { %v2824_v18 = vpop.f32.mrb[23].mxu0  ;;  %v2833_v59 = vadd.f32 %v3754_v56, %v3524_v12  ;;  %v2838_v58 = vadd.f32 %v2830_v16, %v2653_v33  ;;  %v4105_v16 = vld [vmem:[%s5433_s6] sm:$0xff] (!%p3533_p2)   ;;  %v4106_v56 = vld [vmem:[%s5433_s6 + $0x8] sm:$0xff] (!%p3533_p2)  }
 0xec5   : > { %v2825_v19 = vadd.f32 %v3524_v12, %v2824_v18  ;;  %v2836_v20 = vadd.f32 %v2822_v17, %v2651_v32  ;;  %v4445_v17 = vmov (!%p3533_p2), 0.0  }
 0xec6   : > { %v2839_v23 = vadd.f32 %v2833_v59, %v2654_v34  ;;  %v2848_v24 = vsel %vm1541_vm9, %v2838_v58, 0.0  ;;  %3755 = vmatprep.subr.bf16.mxu0 (!%p3533_p2), %v4445_v17  ;;  %3763 = vmatprep.subr.bf16.mxu1 (!%p3533_p2), %v4445_v17  ;;  %v4107_v59 = vld [vmem:[%s5434_s3] sm:$0xff] (!%p3533_p2)  }
 0xec7   : > { %v2842_v60 = vsel %vm1541_vm9, %v2836_v20, 0.0  ;;  %v2837_v21 = vadd.f32 %v2825_v19, %v2652_v4  ;;  %3756 = vmatpush3.bf16.msra.mxu0 (!%p3533_p2), %v4105_v16  ;;  %3759 = vmatprep.mubr.msk.bf16.mxu0 (!%p3533_p2), %vm4446_vm3, %v4445_v17  ;;  %v4108_v19 = vld [vmem:[%s5434_s3 + $0x8] sm:$0xff] (!%p3533_p2)  }
 0xec8   : > { %2843 = vadd.xlane.f32.xlu0 %v2842_v60  ;;  %v2851_v25 = vsel %vm2590_vm1, %v2839_v23, 0.0  ;;  %3757 = vmatprep.subr.bf16.mxu0 (!%p3533_p2), %v4445_v17  ;;  %v2927_v60 = vld [vmem:[#allocation9] sm:$0x1] (!%p3533_p2) }
 0xec9   : > { %v2845_v22 = vsel %vm1541_vm9, %v2837_v21, 0.0  ;;  %3767 = vmatprep.mubr.msk.bf16.mxu1 (!%p3533_p2), %vm4446_vm3, %v4445_v17  ;;  %3764 = vmatpush3.bf16.msra.mxu1 (!%p3533_p2), %v4107_v59 }
 0xeca   : > { %2846 = vadd.xlane.f32.xlu1 %v2845_v22  ;;  %3765 = vmatprep.subr.bf16.mxu1 (!%p3533_p2), %v4445_v17 }
 0xecb   : > { %3758 = vmatpush3.bf16.msra.mxu0 (!%p3533_p2), %v4106_v56 }
 0xecc   : > { %2849 = vadd.xlane.f32.xlu0 %v2848_v24  ;;  %3771 = vmatprep.subr.bf16.mxu0 (!%p3533_p2), %v4445_v17 }
 0xecd   : > { %3766 = vmatpush3.bf16.msra.mxu1 (!%p3533_p2), %v4108_v19 }
 0xece   : > { %2852 = vadd.xlane.f32.xlu1 %v2851_v25 }
 0xf55   : > { %v2844_v26 = vpop.xlane.xlu0 %2843 }
 0xf56   : > { %v2854_v6 = vmul.f32 0.03125, %v2844_v26 }
 0xf57   : > { %v2847_v8 = vpop.xlane.xlu1 %2846 }
 0xf58   : > { %v2858_v13 = vsub.f32 %v2836_v20, %v2854_v6  ;;  %v2855_v7 = vmul.f32 0.03125, %v2847_v8  ;;  %v4109_v20 = vld [vmem:[%s5435_s15] sm:$0xff] (!%p3533_p2)   ;;  %v4110_v6 = vld [vmem:[%s5436_s8 + $0x8] sm:$0xff] (!%p3533_p2)  }
 0xf59   : > { %v2850_v27 = vpop.xlane.xlu0 %2849  ;;  %v2989_v8 = vld [vmem:[#allocation10] sm:$0x1] (!%p3533_p2) }
 0xf5a   : > { %v2859_v5 = vsub.f32 %v2837_v21, %v2855_v7  ;;  %v2856_v28 = vmul.f32 0.03125, %v2850_v27  ;;  %v2862_v38 = vmul.f32 %v2858_v13, %v2858_v13 }
 0xf5b   : > { %v2853_v63 = vpop.xlane.xlu1 %2852 }
 0xf5c   : > { %v2860_v37 = vsub.f32 %v2838_v58, %v2856_v28  ;;  %v2857_v61 = vmul.f32 0.03125, %v2853_v63  ;;  %v2866_v44 = vsel %vm1541_vm9, %v2862_v38, 0.0  ;;  %v2863_v42 = vmul.f32 %v2859_v5, %v2859_v5 }
 0xf5d   : > { %2867 = vadd.xlane.f32.xlu0 %v2866_v44 }
 0xf5e   : > { %v2861_v29 = vsub.f32 %v2839_v23, %v2857_v61  ;;  %v2869_v57 = vsel %vm1541_vm9, %v2863_v42, 0.0  ;;  %v2864_v62 = vmul.f32 %v2860_v37, %v2860_v37 }
 0xf5f   : > { %2870 = vadd.xlane.f32.xlu1 %v2869_v57 }
 0xf60   : > { %v2872_v30 = vsel %vm1541_vm9, %v2864_v62, 0.0  ;;  %v2865_v48 = vmul.f32 %v2861_v29, %v2861_v29 }
 0xf61   : > { %2873 = vadd.xlane.f32.xlu0 %v2872_v30 }
 0xf62   : > { %v2875_v0 = vsel %vm2590_vm1, %v2865_v48, 0.0 }
 0xf63   : > { %2876 = vadd.xlane.f32.xlu1 %v2875_v0 }
 0xfea   : > { %v2868_v31 = vpop.xlane.xlu0 %2867 }
 0xfeb   : > { %v2878_v32 = vmul.f32 0.03125, %v2868_v31 }
 0xfec   : > { %v2871_v4 = vpop.xlane.xlu1 %2870 }
 0xfed   : > { %v2882_v55 = vadd.f32 1e-05, %v2878_v32  ;;  %v2879_v2 = vmul.f32 0.03125, %v2871_v4 }
 0xfee   : > { %v2874_v49 = vpop.xlane.xlu0 %2873 }
 0xfef   : > { %4093 = vrsqrt.f32 %v2882_v55  ;;  %v2883_v3 = vadd.f32 1e-05, %v2879_v2  ;;  %v2880_v33 = vmul.f32 0.03125, %v2874_v49 }
 0xff0   : > { %v2877_v34 = vpop.xlane.xlu1 %2876 }
 0xff1   : > { %4095 = vrsqrt.f32 %v2883_v3  ;;  %v2884_v35 = vadd.f32 1e-05, %v2880_v33  ;;  %v2881_v36 = vmul.f32 0.03125, %v2877_v34 }
 0xff3   : > { %4097 = vrsqrt.f32 %v2884_v35  ;;  %v2885_v1 = vadd.f32 1e-05, %v2881_v36 }
 0xff5   : > { %4099 = vrsqrt.f32 %v2885_v1 }
 0xff9   : > { %v4094_v39 = vpop.eup %4093 }
 0xffa   : > { %v2890_v43 = vmul.f32 %v4094_v39, %v2858_v13 }
 0xffb   : > { %v4096_v45 = vpop.eup %4095 }
 0xffc   : > { %v2900_v47 = vmul.f32 %v3531_v40, %v2890_v43  ;;  %v2891_v50 = vmul.f32 %v4096_v45, %v2859_v5 }
 0xffd   : > { %v4098_v51 = vpop.eup %4097 }
 0xffe   : > { %v2910_v52 = vadd.f32 %v3532_v46, %v2900_v47  ;;  %v2901_v53 = vmul.f32 %v3531_v40, %v2891_v50  ;;  %v2892_v54 = vmul.f32 %v4098_v51, %v2860_v37  ;;  %v3051_v37 = vld [vmem:[#allocation12] sm:$0x1] (!%p3533_p2) }
 0xfff   : > { %v4100_v9 = vpop.eup %4099 }
0x1000   : > { %2914 = vst.msk [vmem:[#allocation2] sm:$0xff] %vm1541_vm9, %v2910_v52  ;;  %v2911_v41 = vadd.f32 %v3532_v46, %v2901_v53  ;;  %v2902_v10 = vmul.f32 %v3531_v40, %v2892_v54  ;;  %v2893_v11 = vmul.f32 %v4100_v9, %v2861_v29  ;;  %2921 = sbr.rel (%p3533_p2) target bundleno = 4775 (0x12a7), region = 168  ;;  %v2922_v18 = vpack.c.bf16 (!%p3533_p2), %v2910_v52, %v2910_v52 }
0x1002   : > { %2915 = vst.msk [vmem:[#allocation2 + $0x8] sm:$0xff] %vm1541_vm9, %v2911_v41  ;;  %v2912_v12 = vadd.f32 %v3532_v46, %v2902_v10  ;;  %v2903_v14 = vmul.f32 %v3531_v40, %v2893_v11  ;;  %3760 = vmatmul.mubr.msk.bf16.vlgmr.msra.gmra.mrb[0].mxu0 (!%p3533_p2), %vm1541_vm9, %v2922_v18 }
0x1003   : > { %3775 = vmatprep.mubr.msk.bf16.mxu0 (!%p3533_p2), %vm4446_vm3, %v4445_v17  ;;  %3772 = vmatpush3.bf16.msra.mxu0 (!%p3533_p2), %v4109_v20 }
0x1004   : > { %2916 = vst.msk [vmem:[#allocation2 + $0x10] sm:$0xff] %vm1541_vm9, %v2912_v12  ;;  %v2913_v15 = vadd.f32 %v3532_v46, %v2903_v14  ;;  %3773 = vmatprep.subr.bf16.mxu0 (!%p3533_p2), %v4445_v17 }
0x1006   : > { %2917 = vst.msk [vmem:[#allocation2 + $0x18] sm:$0x1] %vm2590_vm1, %v2913_v15 }
0x1007   : > { %3774 = vmatpush3.bf16.msra.mxu0 %v4110_v6 }
0x10d5   : > { %v2977_v21 = vpop.f32.mrb[0].mxu0 }
0x10d6   : > { %v2978_v58 = vadd.f32 %v2977_v21, %v2927_v60  ;;  %v3761_v22 = vpop.f32.mrb[1].mxu0 }
0x10d7   : > { %v2980_v23 = vpop.f32.mrb[2].mxu0 }
0x10d8   : > { %v2983_v24 = vmax.f32 %v2978_v58, 0.0  ;;  %v3762_v25 = vpop.f32.mrb[3].mxu0 }
0x10da   : > { %v2984_v26 = vpack.c.bf16 %v2983_v24, %v2983_v24 }
0x10dc   : > { %3768 = vmatmul.mubr.msk.bf16.vlgmr.msra.gmra.mrb[0].mxu1 %vm1541_vm9, %v2984_v26 }
0x11af   : > { %v3039_v13 = vpop.f32.mrb[0].mxu1 }
0x11b0   : > { %v3040_v7 = vadd.f32 %v3039_v13, %v2989_v8  ;;  %v3769_v27 = vpop.f32.mrb[1].mxu1 }
0x11b1   : > { %v3042_v5 = vpop.f32.mrb[2].mxu1 }
0x11b2   : > { %v3045_v28 = vmax.f32 %v3040_v7, 0.0  ;;  %v3770_v38 = vpop.f32.mrb[3].mxu1 }
0x11b4   : > { %v3046_v63 = vpack.c.bf16 %v3045_v28, %v3045_v28 }
0x11b6   : > { %3776 = vmatmul.mubr.msk.bf16.vlgmr.msra.gmra.mrb[4].mxu0 %vm1541_vm9, %v3046_v63 }
0x1289   : > { %v3101_v61 = vpop.f32.mrb[4].mxu0 }
0x128a   : > { %v3102_v44 = vadd.f32 %v3101_v61, %v3051_v37  ;;  %v3777_v42 = vpop.f32.mrb[5].mxu0 }
0x128b   : > { %v3104_v29 = vpop.f32.mrb[6].mxu0 }
0x128c   : > { %v3543_v57 = vmul.f32 -1.442695, %v3102_v44  ;;  %v3778_v62 = vpop.f32.mrb[7].mxu0 }
0x128e   : > { %4111 = vpow2.f32 %v3543_v57 }
0x1298   : > { %v4112_v30 = vpop.eup %4111 }
0x1299   : > { %v3110_v48 = vadd.f32 1.0, %v4112_v30 }
0x129b   : > { %4113 = vrcp.f32 %v3110_v48 }
0x12a5   : > { %v4114_v0 = vpop.eup %4113 }
0x12a6   : > { %3114 = vst.msk [vmem:[%s4920_s23] sm:$0x1] %vm3113_vm4, %v4114_v0 }
0x12a7 PF: > { %s5437_s7 = sld [smem:[#allocation53_spill]]  ;;  %s5438_s28 = sld [smem:[#allocation47_spill]] }
0x12a8   : > { %s5440_s0 = sld [smem:[#allocation57_spill]]  ;;  %s3128_s11 = sshll.u32 %s4920_s23, 4  ;;  %s3129_s11 = int_to_ptr.vmem [resolvable:$true] %s3128_s11 }
0x12a9   : > { %s5441_s29 = sand.u32 1, %s4357_s16   ;;  %s4259_s22 = scalar_lea.vmem %s3129_s11, 16 }
0x12aa   : > { %s3116_s27 = scalar_lea.sflag [#allocation6], %s5441_s29  ;;  %p4260_p10 = scmp.ne.s32.totalorder %s3129_s11, %s4259_s22 }
0x12ab   : > { %s4447_s25 = smov [#allocation13]  }
0x12ac   : > { %s4263_s4 = sshll.u32 %s4447_s25, 4  ;;  %s4264_s4 = int_to_ptr.vmem [resolvable:$false] %s4263_s4 }
0x12ad   : > { %s5439_s20 = smov %s5438_s28  ;;  %s3544_s17 = sshll.u32 %s5437_s7, 4 }
0x12ae   : > { %s5233_s18 = scalar_lea.hbm %s5438_s28, %s3544_s17  ;;  %p5442_p0 = scmp.ne.s32.totalorder %s5440_s0, 0 }
0x12af   : > { %s4265_s1 = scalar_lea.vmem %s4264_s4, 32  ;;  %p4266_p4 = scmp.lt.s32.totalorder %s3129_s11, %s4264_s4 }
0x12b0   : > { %p4261_p5 = pnand %p4260_p10, %p5442_p0  ;;  %p4267_p9 = scmp.lt.s32.totalorder %s4265_s1, %s4259_s22 }
0x12b2   : > { %p4262_p13 = pneg %p4261_p5  ;;  %p4268_p3 = por %p4267_p9, %p4266_p4 }
0x12b4   : > { %p4269_p6 = pnand %p4268_p3, %p4262_p13 }
0x12b6   : > { %4272 = shalt.err (!%p4269_p6)
}
0x12b7   : > { %s4273_s23 = scalar_lea.hbm %s5233_s18, 16  ;;  %s4277_s26 = scalar_lea.hbm %s5439_s20, 32 }
0x12b8   : > { %p4274_p8 = scmp.ne.s32.totalorder %s5233_s18, %s4273_s23  ;;  %p4278_p11 = scmp.lt.u32.totalorder %s5233_s18, %s5439_s20 }
0x12b9   : > { %p4279_p12 = scmp.lt.u32.totalorder %s4277_s26, %s4273_s23  ;;  %p4281_p10 = scmp.lt.u32.totalorder %s4273_s23, %s5233_s18 }
0x12ba   : > { %p4275_p1 = pnand %p4274_p8, %p5442_p0 }
0x12bb   : > { %p4280_p2 = por %p4279_p12, %p4278_p11 }
0x12bc   : > { %p4276_p7 = pneg %p4275_p1 }
0x12bd   : > { %p4282_p5 = por %p4281_p10, %p4280_p2 }
0x12bf   : > { %p4283_p13 = pnand %p4282_p5, %p4276_p7 }
0x12c1   : > { %4286 = shalt.err (!%p4283_p13)
}
0x12c2   : > { %3803 = dma.vmem_to_hbm [thread:$0]  (%p5442_p0), %s3129_s11, 16, %s5233_s18, %s3116_s27  }
0x12c3 PF: > { %s5443_s2 = sld [smem:[#allocation56_spill]]  ;;  %s5444_s5 = sld [smem:[#allocation48_spill]] }
0x12c4   : > { %s5445_s9 = sld [smem:[#allocation58_spill]] }
0x12c9   : > { %p3833_p4 = scmp.ge.s32.totalorder %s5443_s2, 2  ;;  %s3140_s13 = sand.u32 1, %s5444_s5  }
0x12ca   : > { %p5446_p9 = scmp.ne.s32.totalorder %s5445_s9, 0  ;;  %s3141_s10 = scalar_lea.sflag [#allocation6], %s3140_s13 }
0x12cc   : > { %p3823_p3 = pnand %p3833_p4, %p5446_p9 }
0x12ce   : > { %4348 = dma.done.wait (!%p3823_p3), %s3141_s10, 16  }
0x12cf   : > { %4350 = vsyncadd (!%p3823_p3), %s3141_s10, 4294967280  ;;  %s81_s7 = sadd.s32 1, %s5443_s2   ;;  %s5447_s12 = sld [smem:[#allocation49_spill]] }
0x12d0   : > { %p78_p6 = scmp.ge.s32.totalorder %s81_s7, 6   ;;  %s5448_s18 = sld [smem:[#allocation62_spill]] }
0x12d1   : > { %s5449_s22 = sld [smem:[#allocation50_spill]]  ;;  %s5450_s23 = sld [smem:[#allocation51_spill]] }
0x12d2   : > { %s5451_s26 = sld [smem:[#allocation61_spill]]  ;;  %s5452_s0 = sld [smem:[#allocation54_spill]] }
0x12d3   : > { %s5453_s28 = sld [smem:[#allocation55_spill]]  ;;  %s5454_s1 = sld [smem:[#allocation59_spill]] }
0x12d4   : > { %s5455_s2 = sld [smem:[#allocation60_spill]]  ;;  %s5456_s15 = smov %s4357_s16 }
0x12d5   : > { %s5457_s16 = smov %s5447_s12  ;;  %80 = sbr.rel (!%p78_p6) target bundleno = 78 (0x4e), region = 296 }
0x12dc   :  { %3145 = vsyncpa [#allocation5], 1 }
0x12dd   :  { %3147 = vsyncpa [#allocation5 + $0x1], 1 }
0x12de   :  { %3148 = vsyncpa [#allocation8], 1 }
0x12df   :  { %3150 = vsyncpa [#allocation8 + $0x1], 1 }
0x12e0   :  { %3151 = vsyncpa [#allocation11], 1 }
0x12e1   :  { %3152 = vsyncpa [#allocation6], 1 }
0x12e2   :  { %3154 = vsyncpa [#allocation6 + $0x1], 1 }

</bundles_post_ra>
